<compile_context>
chip_gen: v5e
topology: v5e:2x2
jax: 0.10.0
libtpu: 0.0.40
codegen_flags: <defaults>
</compile_context>

<pallas_src>
import jax
import jax.numpy as jnp
import numpy as np
from jax import lax
from jax.experimental import pallas as pl
from jax.experimental.pallas import tpu as pltpu

HIDDEN = 256                      # Conv2d(cin, 256, 3, padding=1)
HEAD_ORDER = ('cls', 'reg', 'obj')


def _round_up(x, m):
    return ((x + m - 1) // m) * m


def _vmem_limit_bytes():
    """Raise the scoped-VMEM budget (defaults: 16/32 MiB) with headroom."""
    try:
        cap = pltpu.get_tpu_info().vmem_capacity_bytes
        return int(cap) * 3 // 4
    except Exception:
        return None               # fall back to the compiler default


def _band_rows(H, Wp, max_cols):
    """Rows per band so one band's flat output is ~<= max_cols lanes."""
    th_max = max(1, min(H, max_cols // Wp))
    nb = -(-H // th_max)          # ceil
    return -(-H // nb)            # even-ish split


# ----------------------------------------------------------------------------
# Pallas kernel: fused (3x3 conv -> bias -> ReLU -> 1x1 conv -> bias) for all
# three heads; one (batch, row-band) tile per grid step.
# ----------------------------------------------------------------------------
def run_level(xbands, fused, Wp, TLpad, out_ch):
    """xbands: (N, NB, C, band_len) bf16 -> (N, NB, out_ch, TLpad) f32."""
    N, NB, C, band_len = xbands.shape
    hid3, Kpad = fused['w1k'].shape
    taps = [dy * Wp + dx for dy in range(3) for dx in range(3)]   # static shifts

    def kernel(x_ref, w1_ref, b1_ref, w2_ref, b2_ref, o_ref):
        # x_ref : (1, 1, C, band_len)   bf16 zero-padded flat row band
        # w1_ref: (hid3, Kpad)          bf16 stacked-tap 3x3 weights (3 heads)
        # b1_ref: (hid3, 1)             f32
        # w2_ref: (out_ch, hid3)        bf16 block-diagonal 1x1 weights
        # b2_ref: (out_ch, 1)           f32
        # o_ref : (1, 1, out_ch, TLpad) f32 (lane-dense, 128-aligned)
        x = x_ref[0, 0]                                     # (C, band_len) bf16
        pieces = [x[:, off:off + TLpad] for off in taps]    # 9 static windows
        if Kpad > 9 * C:                                    # zero rows matching
            pieces.append(jnp.zeros((Kpad - 9 * C, TLpad), jnp.bfloat16))
        stack = jnp.concatenate(pieces, axis=0)             # (Kpad, TLpad) bf16
        # One stacked-K matmul: MXU accumulates over K = 9*C internally.
        h = jnp.dot(w1_ref[...], stack, preferred_element_type=jnp.float32)
        h = jnp.maximum(h + b1_ref[...], 0.0)               # bias + ReLU in f32
        o = jnp.dot(w2_ref[...], h.astype(jnp.bfloat16),    # fused 1x1 convs
                    preferred_element_type=jnp.float32)
        o_ref[0, 0] = o + b2_ref[...]                       # (out_ch, TLpad)

    return pl.pallas_call(
        kernel,
        out_shape=jax.ShapeDtypeStruct((N, NB, out_ch, TLpad), jnp.float32),
        grid_spec=pltpu.PrefetchScalarGridSpec(
            num_scalar_prefetch=0,
            grid=(N, NB),
            in_specs=[
                pl.BlockSpec((1, 1, C, band_len), lambda n, b: (n, b, 0, 0)),
                pl.BlockSpec((hid3, Kpad), lambda n, b: (0, 0)),
                pl.BlockSpec((hid3, 1), lambda n, b: (0, 0)),
                pl.BlockSpec((out_ch, hid3), lambda n, b: (0, 0)),
                pl.BlockSpec((out_ch, 1), lambda n, b: (0, 0)),
            ],
            out_specs=pl.BlockSpec((1, 1, out_ch, TLpad),
                                   lambda n, b: (n, b, 0, 0)),
        ),
        compiler_params=pltpu.CompilerParams(
            dimension_semantics=("parallel", "parallel"),
            vmem_limit_bytes=_vmem_limit_bytes(),
        ),
    )(xbands, fused['w1k'], fused['b1'], fused['w2bd'], fused['b2'])


# ----------------------------------------------------------------------------
# Host-side glue: banding/padding, parameter init and head fusion
# ----------------------------------------------------------------------------
def band_and_pad(x, TH, TLpad):
    """(N,C,H,W) f32 -> (N, NB, C, band_len) bf16 zero-padded, row-banded, flat.

    Each band holds TH output rows plus a 2-row halo (its last two padded rows
    are duplicated as the next band's first two) so every in-kernel window
    slice is static and bands are independent.  Explicit zero padding is kept
    so garbage never enters the computed-but-discarded lanes.
    """
    N, C, H, W = x.shape
    Wp = W + 2
    NB = -(-H // TH)
    Hpad = NB * TH
    band_len = 2 * Wp + 2 + TLpad
    xp = jnp.pad(x.astype(jnp.bfloat16),
                 ((0, 0), (0, 0), (1, 1 + Hpad - H), (1, 1)))
    xpf = xp.reshape(N, C, (Hpad + 2) * Wp)
    extra = (NB - 1) * TH * Wp + band_len - (Hpad + 2) * Wp
    if extra > 0:
        xpf = jnp.pad(xpf, ((0, 0), (0, 0), (0, extra)))
    bands = jnp.stack(
        [xpf[:, :, b * TH * Wp: b * TH * Wp + band_len] for b in range(NB)],
        axis=1)
    return bands                                             # (N, NB, C, band_len)


def init_head_params(key, cin, out_ch):
    """Conv2d(cin,256,3,pad=1) + Conv2d(256,out_ch,1), torch weight layout."""
    k1, k2, k3, k4 = jax.random.split(key, 4)
    w1 = jax.random.normal(k1, (HIDDEN, cin, 3, 3), jnp.float32) / np.sqrt(9 * cin)
    b1 = jax.random.normal(k2, (HIDDEN,), jnp.float32) * 0.01
    w2 = jax.random.normal(k3, (out_ch, HIDDEN), jnp.float32) / np.sqrt(HIDDEN)
    b2 = jax.random.normal(k4, (out_ch,), jnp.float32) * 0.01
    return dict(w1=w1, b1=b1, w2=w2, b2=b2)


def fuse_level_params(heads, cin):
    """Fuse the 3 heads of one level into single bf16 kernel operands."""
    hid3 = 3 * HIDDEN
    # 3x3 weights: concat heads on O -> stacked-tap (hid3, 9*cin), tap order
    # (dy*3+dx) matching the in-kernel stack, K zero-padded to a 128 multiple.
    w1_all = jnp.concatenate([heads[h]['w1'] for h in HEAD_ORDER], axis=0)
    w1k = jnp.transpose(w1_all, (0, 2, 3, 1)).reshape(hid3, 9 * cin)
    Kpad = _round_up(9 * cin, 128)
    w1k = jnp.pad(w1k, ((0, 0), (0, Kpad - 9 * cin)))
    b1 = jnp.concatenate([heads[h]['b1'] for h in HEAD_ORDER]).reshape(hid3, 1)
    # 1x1 weights: block-diagonal (out_ch, 768) so one matmul serves all heads
    out_ch = sum(heads[h]['w2'].shape[0] for h in HEAD_ORDER)
    w2bd = jnp.zeros((out_ch, hid3), jnp.float32)
    row = 0
    for hi, h in enumerate(HEAD_ORDER):
        w2 = heads[h]['w2']
        w2bd = w2bd.at[row:row + w2.shape[0],
                       hi * HIDDEN:(hi + 1) * HIDDEN].set(w2)
        row += w2.shape[0]
    b2 = jnp.concatenate([heads[h]['b2'] for h in HEAD_ORDER]).reshape(out_ch, 1)
    return dict(w1k=w1k.astype(jnp.bfloat16), b1=b1,
                w2bd=w2bd.astype(jnp.bfloat16), b2=b2)


class DetectionHeadPallas:
    """Anchor-free detection head (FCOS style) — fused Pallas TPU implementation."""

    def __init__(self, in_channels, num_classes=3, seed=0, max_band_cols=2048):
        self.num_classes = num_classes
        self.out_ch = num_classes + 4 + 1
        self.max_band_cols = max_band_cols       # ~flat output lanes per band
        key = jax.random.PRNGKey(seed)
        self.params = []       # per-level, per-head torch-layout params (reference)
        self.fused = []        # per-level fused kernel operands
        for cin in in_channels:
            key, kc, kr, ko = jax.random.split(key, 4)
            heads = {'cls': init_head_params(kc, cin, num_classes),
                     'reg': init_head_params(kr, cin, 4),
                     'obj': init_head_params(ko, cin, 1)}
            self.params.append(heads)
            self.fused.append(fuse_level_params(heads, cin))

    def __call__(self, features):
        """features: list of (N, C, H, W) -> list of dicts of NCHW predictions."""
        nc = self.num_classes
        outputs = []
        for i, feat in enumerate(features):
            N, C, H, W = feat.shape
            Wp = W + 2
            TH = _band_rows(H, Wp, self.max_band_cols)
            NB = -(-H // TH)
            TLpad = _round_up(TH * Wp, 128)              # 128-aligned lane dim
            xb = band_and_pad(feat, TH, TLpad)           # (N, NB, C, band_len) bf16
            o = run_level(xb, self.fused[i], Wp, TLpad, self.out_ch)
            # Epilogue: drop alignment junk, undo flat-window layout, stitch bands.
            o = o[:, :, :, :TH * Wp].reshape(N, NB, self.out_ch, TH, Wp)[..., :W]
            o = jnp.moveaxis(o, 1, 2).reshape(N, self.out_ch, NB * TH, W)[:, :, :H]
            outputs.append({'cls': o[:, :nc],
                            'reg': o[:, nc:nc + 4],
                            'obj': o[:, nc + 4:]})
        return outputs


# ----------------------------------------------------------------------------
# Pure-JAX reference (real conv) with matching bf16 operand quantization
# ----------------------------------------------------------------------------
def ref_head(x, p):
    xq = x.astype(jnp.bfloat16).astype(jnp.float32)
    w1q = p['w1'].astype(jnp.bfloat16).astype(jnp.float32)
    w2q = p['w2'].astype(jnp.bfloat16).astype(jnp.float32)
    h = lax.conv_general_dilated(xq, w1q, (1, 1), 'SAME',
                                 dimension_numbers=('NCHW', 'OIHW', 'NCHW'))
    h = jnp.maximum(h + p['b1'][None, :, None, None], 0.0)
    hq = h.astype(jnp.bfloat16).astype(jnp.float32)
    o = jnp.einsum('oc,nchw->nohw', w2q, hq) + p['b2'][None, :, None, None]
    return o


if __name__ == "__main__":
    key = jax.random.PRNGKey(0)
    num_classes = 3
    in_channels = [4, 8]                 # two pyramid levels
    spatial = [(16, 12), (8, 8)]         # non-square level exercises H != W
    batch = 2

    # max_band_cols=192 forces 2 row bands on the 16x12 level so the spatial
    # grid axis / halo bookkeeping is actually exercised in this test.
    head = DetectionHeadPallas(in_channels, num_classes=num_classes, seed=0,
                               max_band_cols=192)

    feats = []
    for c, (h_, w_) in zip(in_channels, spatial):
        key, sub = jax.random.split(key)
        feats.append(jax.random.normal(sub, (batch, c, h_, w_), jnp.float32))

    outs = head(feats)
    jax.block_until_ready(outs)

    expected_ch = {'cls': num_classes, 'reg': 4, 'obj': 1}
    for i, (feat, level) in enumerate(zip(feats, outs)):
        N, C, H, W = feat.shape
        for name, oc in expected_ch.items():
            got = np.asarray(level[name])
            assert got.shape == (N, oc, H, W), (name, got.shape)
            ref = np.asarray(ref_head(feat, head.params[i][name]))
            np.testing.assert_allclose(got, ref, rtol=3e-3, atol=3e-3)

    print("KERNEL_OK")
</pallas_src>

<mosaic_0001>
module attributes {stable_mosaic.version = 11 : i64} {
  func.func @kernel(%arg0: i32, %arg1: i32, %arg2: memref<1x1x4x158xbf16, #tpu.memory_space<vmem>>, %arg3: memref<768x128xbf16, #tpu.memory_space<vmem>>, %arg4: memref<768x1xf32, #tpu.memory_space<vmem>>, %arg5: memref<8x768xbf16, #tpu.memory_space<vmem>>, %arg6: memref<8x1xf32, #tpu.memory_space<vmem>>, %arg7: memref<1x1x8x128xf32, #tpu.memory_space<vmem>>) attributes {dimension_semantics = [#tpu.dimension_semantics<parallel>, #tpu.dimension_semantics<parallel>], iteration_bounds = array<i64: 2, 2>, scalar_prefetch = 0 : i64, scratch_operands = 0 : i64, tpu.core_type = #tpu.core_type<tc>, window_params = [{transform_indices = @transform_0, window_bounds = array<i64: 1, 1, 4, 158>}, {pipeline_mode = #tpu.pipeline_mode<synchronous>, transform_indices = @transform_1, window_bounds = array<i64: 768, 128>}, {pipeline_mode = #tpu.pipeline_mode<synchronous>, transform_indices = @transform_2, window_bounds = array<i64: 768, 1>}, {pipeline_mode = #tpu.pipeline_mode<synchronous>, transform_indices = @transform_3, window_bounds = array<i64: 8, 768>}, {pipeline_mode = #tpu.pipeline_mode<synchronous>, transform_indices = @transform_4, window_bounds = array<i64: 8, 1>}, {transform_indices = @transform_5, window_bounds = array<i64: 1, 1, 8, 128>}]} {
    %c0 = arith.constant 0 : index
    %c0_0 = arith.constant 0 : index
    %c0_1 = arith.constant 0 : index
    %c0_2 = arith.constant 0 : index
    %0 = vector.load %arg2[%c0, %c0_0, %c0_1, %c0_2] : memref<1x1x4x158xbf16, #tpu.memory_space<vmem>>, vector<1x1x4x158xbf16>
    %1 = vector.shape_cast %0 : vector<1x1x4x158xbf16> to vector<4x158xbf16>
    %2 = vector.extract_strided_slice %1 {offsets = [0, 0], sizes = [4, 128], strides = [1, 1]} : vector<4x158xbf16> to vector<4x128xbf16>
    %3 = vector.extract_strided_slice %1 {offsets = [0, 1], sizes = [4, 128], strides = [1, 1]} : vector<4x158xbf16> to vector<4x128xbf16>
    %4 = vector.extract_strided_slice %1 {offsets = [0, 2], sizes = [4, 128], strides = [1, 1]} : vector<4x158xbf16> to vector<4x128xbf16>
    %5 = vector.extract_strided_slice %1 {offsets = [0, 14], sizes = [4, 128], strides = [1, 1]} : vector<4x158xbf16> to vector<4x128xbf16>
    %6 = vector.extract_strided_slice %1 {offsets = [0, 15], sizes = [4, 128], strides = [1, 1]} : vector<4x158xbf16> to vector<4x128xbf16>
    %7 = vector.extract_strided_slice %1 {offsets = [0, 16], sizes = [4, 128], strides = [1, 1]} : vector<4x158xbf16> to vector<4x128xbf16>
    %8 = vector.extract_strided_slice %1 {offsets = [0, 28], sizes = [4, 128], strides = [1, 1]} : vector<4x158xbf16> to vector<4x128xbf16>
    %9 = vector.extract_strided_slice %1 {offsets = [0, 29], sizes = [4, 128], strides = [1, 1]} : vector<4x158xbf16> to vector<4x128xbf16>
    %10 = vector.extract_strided_slice %1 {offsets = [0, 30], sizes = [4, 128], strides = [1, 1]} : vector<4x158xbf16> to vector<4x128xbf16>
    %cst = arith.constant 0.000000e+00 : bf16
    %11 = vector.broadcast %cst : bf16 to vector<92x128xbf16>
    %12 = tpu.concatenate %2, %3, %4, %5, %6, %7, %8, %9, %10, %11 in 0 : vector<4x128xbf16>, vector<4x128xbf16>, vector<4x128xbf16>, vector<4x128xbf16>, vector<4x128xbf16>, vector<4x128xbf16>, vector<4x128xbf16>, vector<4x128xbf16>, vector<4x128xbf16>, vector<92x128xbf16> -> vector<128x128xbf16>
    %c0_3 = arith.constant 0 : index
    %c0_4 = arith.constant 0 : index
    %13 = vector.load %arg3[%c0_3, %c0_4] : memref<768x128xbf16, #tpu.memory_space<vmem>>, vector<768x128xbf16>
    %cst_5 = arith.constant dense<0.000000e+00> : vector<768x128xf32>
    %14 = tpu.matmul %13, %12, %cst_5 {dimension_numbers = #tpu.dot_dimension_numbers<[1], [0], [0], [1], [0, 0, 1, 1], [], []>} : vector<768x128xbf16>, vector<128x128xbf16>, vector<768x128xf32> -> vector<768x128xf32>
    %c0_6 = arith.constant 0 : index
    %c0_7 = arith.constant 0 : index
    %15 = vector.load %arg4[%c0_6, %c0_7] : memref<768x1xf32, #tpu.memory_space<vmem>>, vector<768x1xf32>
    %16 = vector.broadcast %15 : vector<768x1xf32> to vector<768x128xf32>
    %17 = arith.addf %14, %16 : vector<768x128xf32>
    %cst_8 = arith.constant 0.000000e+00 : f32
    %18 = vector.broadcast %cst_8 : f32 to vector<768x128xf32>
    %19 = arith.maximumf %17, %18 : vector<768x128xf32>
    %c0_9 = arith.constant 0 : index
    %c0_10 = arith.constant 0 : index
    %20 = vector.load %arg5[%c0_9, %c0_10] : memref<8x768xbf16, #tpu.memory_space<vmem>>, vector<8x768xbf16>
    %21 = arith.truncf %19 : vector<768x128xf32> to vector<768x128xbf16>
    %cst_11 = arith.constant dense<0.000000e+00> : vector<8x128xf32>
    %22 = tpu.matmul %20, %21, %cst_11 {dimension_numbers = #tpu.dot_dimension_numbers<[1], [0], [0], [1], [0, 0, 1, 1], [], []>} : vector<8x768xbf16>, vector<768x128xbf16>, vector<8x128xf32> -> vector<8x128xf32>
    %c0_12 = arith.constant 0 : index
    %c0_13 = arith.constant 0 : index
    %23 = vector.load %arg6[%c0_12, %c0_13] : memref<8x1xf32, #tpu.memory_space<vmem>>, vector<8x1xf32>
    %24 = vector.broadcast %23 : vector<8x1xf32> to vector<8x128xf32>
    %25 = arith.addf %22, %24 : vector<8x128xf32>
    %c0_14 = arith.constant 0 : index
    %c0_15 = arith.constant 0 : index
    %c0_16 = arith.constant 0 : index
    %c0_17 = arith.constant 0 : index
    %26 = vector.load %arg7[%c0_14, %c0_15, %c0_16, %c0_17] : memref<1x1x8x128xf32, #tpu.memory_space<vmem>>, vector<1x1x8x128xf32>
    %27 = vector.shape_cast %26 : vector<1x1x8x128xf32> to vector<8x128xf32>
    %28 = vector.shape_cast %25 : vector<8x128xf32> to vector<1x1x8x128xf32>
    tpu.vector_store %arg7[%c0_14, %c0_15, %c0_16, %c0_17], %28 {strides = array<i32>} : memref<1x1x8x128xf32, #tpu.memory_space<vmem>>, vector<1x1x8x128xf32>,
    return
  }
  func.func @transform_0(%arg0: i32, %arg1: i32) -> (i32, i32, i32, i32) {
    %c0_i32 = arith.constant 0 : i32
    %c0_i32_0 = arith.constant 0 : i32
    %c0_i32_1 = arith.constant 0 : i32
    return %arg0, %arg1, %c0_i32, %c0_i32_0 : i32, i32, i32, i32
  }
  func.func @transform_1(%arg0: i32, %arg1: i32) -> (i32, i32) {
    %c0_i32 = arith.constant 0 : i32
    %c0_i32_0 = arith.constant 0 : i32
    %c0_i32_1 = arith.constant 0 : i32
    return %c0_i32, %c0_i32_0 : i32, i32
  }
  func.func @transform_2(%arg0: i32, %arg1: i32) -> (i32, i32) {
    %c0_i32 = arith.constant 0 : i32
    %c0_i32_0 = arith.constant 0 : i32
    %c0_i32_1 = arith.constant 0 : i32
    return %c0_i32, %c0_i32_0 : i32, i32
  }
  func.func @transform_3(%arg0: i32, %arg1: i32) -> (i32, i32) {
    %c0_i32 = arith.constant 0 : i32
    %c0_i32_0 = arith.constant 0 : i32
    %c0_i32_1 = arith.constant 0 : i32
    return %c0_i32, %c0_i32_0 : i32, i32
  }
  func.func @transform_4(%arg0: i32, %arg1: i32) -> (i32, i32) {
    %c0_i32 = arith.constant 0 : i32
    %c0_i32_0 = arith.constant 0 : i32
    %c0_i32_1 = arith.constant 0 : i32
    return %c0_i32, %c0_i32_0 : i32, i32
  }
  func.func @transform_5(%arg0: i32, %arg1: i32) -> (i32, i32, i32, i32) {
    %c0_i32 = arith.constant 0 : i32
    %c0_i32_0 = arith.constant 0 : i32
    %c0_i32_1 = arith.constant 0 : i32
    return %arg0, %arg1, %c0_i32, %c0_i32_0 : i32, i32, i32, i32
  }
}

</mosaic_0001>

<bundles_post_ra>
// kernel: tpu_custom_call.1
= control target key start
LH: loop header
LB: loop body
LE: loop exit
PB: predicated region body
PF: predicated region fallthrough
CT: control target
= control target key end

     0   :  { %10 = vsyncpa [#allocation3], 0  ;;  %s3392_s0 = inlined_call_operand.vmem [shape: bf16[2,2,4,158], index: 0, kind: input, shape index: {}]   ;;  %s3393_s1 = inlined_call_operand.vmem [shape: bf16[768,128], index: 1, kind: input, shape index: {}]   ;;  %s3394_s2 = inlined_call_operand.vmem [shape: f32[768,1], index: 2, kind: input, shape index: {}]   ;;  %s3395_s3 = inlined_call_operand.vmem [shape: bf16[8,768], index: 3, kind: input, shape index: {}]   ;;  %s3396_s4 = inlined_call_operand.vmem [shape: f32[8,1], index: 4, kind: input, shape index: {}]   ;;  %s3397_s5 = inlined_call_operand.hbm [shape: f32[2,2,8,128], index: 5, kind: output, shape index: {}]  }
   0x1   :  { %12 = vsyncpa [#allocation3 + $0x1], 0  ;;  %s2412_s18 = smov 0   ;;  %s2414_s19 = smov 0  }
   0x2   :  { %s2416_s20 = smov 0   ;;  %s2418_s21 = smov 0  }
   0x3   :  { %s2420_s22 = smov 0   ;;  %s2422_s23 = smov 0  }
   0x4   :  { %s2424_s24 = smov 0   ;;  %s2426_s25 = smov 0  }
   0x5 LB: > { %s1931_s26 = sadd.s32 4294967295, %s2371_s25   ;;  %s1932_s27 = sadd.s32 4294967294, %s2371_s25   ;;  %s2371_s25 = sphi %s2426_s25, %s18_s25   ;;  %s2367_s24 = sphi %s2424_s24, %s3520_s24   ;;  %s2363_s23 = sphi %s2422_s23, %s3519_s23   ;;  %s2359_s22 = sphi %s2420_s22, %s3518_s22   ;;  %s2355_s21 = sphi %s2418_s21, %s3517_s21   ;;  %s2351_s20 = sphi %s2416_s20, %s3516_s20   ;;  %s2347_s19 = sphi %s2414_s19, %s3515_s19   ;;  %s2343_s18 = sphi %s2412_s18, %s3514_s18  }
   0x6   : > { %s27_s28 = sadd.s32 1, %s2363_s23  ;;  %s30_s29 = sadd.s32 1, %s2367_s24 }
   0x7   : > { %p28_p0 = scmp.ge.s32.totalorder %s27_s28, 2  ;;  %p161_p1 = scmp.ne.s32.totalorder %s2351_s20, %s2347_s19 }
   0x8   : > { %p162_p2 = scmp.eq.s32.totalorder %s1931_s26, 3  ;;  %p167_p5 = scmp.ne.s32.totalorder %s2347_s19, %s2343_s18 }
   0x9   : > { %s3522_s28 = smov (%p28_p0, %s27_s28), 0  ;;  %s3524_s29 = smov (!%p28_p0, %s30_s29), %s2367_s24 }
   0xa   : > { %s147_s30 = ssub.s32 %s2363_s23, %s3522_s28  ;;  %p2463_p3 = por %p162_p2, %p161_p1 }
   0xb   : > { %p32_p4 = scmp.ge.s32.totalorder %s3524_s29, 2  ;;  %p168_p6 = scmp.eq.s32.totalorder %s1932_s27, 3 }
   0xc   : > { %p1935_p7 = scmp.ge.s32.totalorder %s2371_s25, 1  ;;  %p210_p9 = scmp.lt.s32.totalorder %s2371_s25, 5 }
   0xd   : > { %s3526_s29 = smov (%p32_p4, %s3524_s29), 0  ;;  %p2472_p8 = por %p168_p6, %p167_p5 }
   0xe   : > { %s146_s8 = ssub.s32 %s2367_s24, %s3526_s29  ;;  %s151_s9 = sadd.s32 1, %s2351_s20 }
   0xf   : > { %s148_s10 = sor.u32 %s147_s30, %s146_s8  ;;  %p211_p10 = pnand %p1935_p7, %p210_p9 }
  0x10   : > { %p149_p11 = scmp.eq.s32.totalorder %s148_s10, 0 }
  0x11   : > { %214 = sbr.rel (%p211_p10) target bundleno = 791 (0x317), region = 40 }
  0x12   : > { %s2481_s11 = scalar_select %p149_p11, %s2351_s20, %s151_s9  }
  0x16   : > { %p242_p12 = scmp.lt.s32.totalorder %s2359_s22, 1  ;;  %p244_p13 = scmp.lt.s32.totalorder %s2355_s21, 1  ;;  %v2376_v9 = vmov 0   ;;  %v466_v16 = vld [vmem:[%s3394_s2] sm:$0xff]  ;;  %v469_v19 = vld [vmem:[%s3394_s2 + $0x18] sm:$0xff]  ;;  %v471_v20 = vld [vmem:[%s3394_s2 + $0x28] sm:$0xff] }
  0x17   : > { %s2373_s8 = smov 127   ;;  %s2374_s9 = smov 126   ;;  %2274 = vset.pattern.permute.xlu1 %v2376_v9  ;;  %2276 = vset.pattern.permute.xlu0 %v2376_v9  ;;  %v468_v21 = vld [vmem:[%s3394_s2 + $0x10] sm:$0xff]  ;;  %v467_v22 = vld [vmem:[%s3394_s2 + $0x8] sm:$0xff]  ;;  %v474_v23 = vld [vmem:[%s3394_s2 + $0x40] sm:$0xff]  ;;  %vm346_vm0 = vcmask 801792  }
  0x18   : > { %s243_s12 = scalar_select %p242_p12, %s2359_s22, 1  ;;  %2275 = vset.pattern.permute.xlu2 %v2376_v9  ;;  %v473_v24 = vld [vmem:[%s3394_s2 + $0x38] sm:$0xff]  ;;  %v470_v25 = vld [vmem:[%s3394_s2 + $0x20] sm:$0xff]  ;;  %v476_v27 = vld [vmem:[%s3394_s2 + $0x50] sm:$0xff]  ;;  %vm348_vm1 = vcmask 1041408   ;;  %vm264_vm2 = vcmask 1039360  }
  0x19   : > { %s245_s13 = scalar_select %p244_p13, %s2355_s21, 1  ;;  %v477_v26 = vld [vmem:[%s3394_s2 + $0x58] sm:$0xff]  ;;  %v472_v28 = vld [vmem:[%s3394_s2 + $0x30] sm:$0xff]  ;;  %v479_v30 = vld [vmem:[%s3394_s2 + $0x68] sm:$0xff]  ;;  %vm299_vm3 = vcmask 924672   ;;  %vm311_vm4 = vcmask 916480  }
  0x1a   : > { %s1938_s14 = sshll.u32 %s243_s12, 2  ;;  %s2375_s10 = smov 114   ;;  %v480_v29 = vld [vmem:[%s3394_s2 + $0x70] sm:$0xff]  ;;  %v475_v31 = vld [vmem:[%s3394_s2 + $0x48] sm:$0xff]  ;;  %v482_v33 = vld [vmem:[%s3394_s2 + $0x80] sm:$0xff]  ;;  %vm323_vm5 = vcmask 818176  }
  0x1b   : > { %s1937_s15 = sshll.u32 %s245_s13, 1  ;;  %s2377_s12 = smov 113   ;;  %v483_v32 = vld [vmem:[%s3394_s2 + $0x88] sm:$0xff]  ;;  %v478_v34 = vld [vmem:[%s3394_s2 + $0x60] sm:$0xff]  ;;  %v485_v36 = vld [vmem:[%s3394_s2 + $0x98] sm:$0xff]  ;;  %vm276_vm6 = vcmask 1031168  }
  0x1c   : > { %s248_s16 = sadd.s32 %s1938_s14, %s1937_s15  ;;  %s2378_s13 = smov 112   ;;  %v486_v35 = vld [vmem:[%s3394_s2 + $0xa0] sm:$0xff]  ;;  %v481_v37 = vld [vmem:[%s3394_s2 + $0x78] sm:$0xff]  ;;  %v488_v40 = vld [vmem:[%s3394_s2 + $0xb0] sm:$0xff]  ;;  %vm335_vm7 = vcmask 809984   ;;  %vm351_vm8 = vcmask 1043456  }
  0x1d   : > { %s1939_s17 = sshll.u32 %s248_s16, 1  ;;  %s2379_s14 = smov 100   ;;  %v489_v39 = vld [vmem:[%s3394_s2 + $0xb8] sm:$0xff]  ;;  %v484_v41 = vld [vmem:[%s3394_s2 + $0x90] sm:$0xff]  ;;  %v491_v44 = vld [vmem:[%s3394_s2 + $0xc8] sm:$0xff]  ;;  %vm288_vm9 = vcmask 932864  }
  0x1e   : > { %s250_s30 = scalar_lea.vmem %s3392_s0, %s1939_s17  ;;  %s2380_s17 = smov 98   ;;  %v492_v43 = vld [vmem:[%s3394_s2 + $0xd0] sm:$0xff]  ;;  %v487_v45 = vld [vmem:[%s3394_s2 + $0xa8] sm:$0xff]  ;;  %v494_v49 = vld [vmem:[%s3394_s2 + $0xe0] sm:$0xff]  ;;  %vm354_vm10 = vcmask 1045504  }
  0x1f   : > { %v2490_v0 = vld [vmem:[%s250_s30] sm:$0xf]  ;;  %s2381_s30 = smov 99   ;;  %v495_v48 = vld [vmem:[%s3394_s2 + $0xe8] sm:$0xff]  ;;  %v497_v54 = vld [vmem:[%s3394_s2 + $0xf8] sm:$0xff] }
  0x20   : > { %255 = vst [vmem:[#allocation1 + $0x1] ss:$4 sm:$0xff] %v2490_v0  ;;  %v490_v51 = vld [vmem:[%s3394_s2 + $0xc0] sm:$0xff]  ;;  %v493_v56 = vld [vmem:[%s3394_s2 + $0xd8] sm:$0xff]  ;;  %v500_v60 = vld [vmem:[%s3394_s2 + $0x110] sm:$0xff] }
  0x21   : > { %v498_v53 = vld [vmem:[%s3394_s2 + $0x100] sm:$0xff]  ;;  %v501_v59 = vld [vmem:[%s3394_s2 + $0x118] sm:$0xff]  ;;  %v496_v61 = vld [vmem:[%s3394_s2 + $0xf0] sm:$0xff] }
  0x22   : > { %v506_v9 = vld [vmem:[%s3394_s2 + $0x140] sm:$0xff] }
  0x27   : > { %v256_v1 = vld.sshfl [vmem:[#allocation1] sm:$0xff pattern:$0x73625140]  ;;  %v258_v2 = vld.sshfl [vmem:[#allocation1 + $0x8] sm:$0xff pattern:$0x73625140] }
  0x28   : > { %260 = vrot.lane.b32.xlu0 %v256_v1, %s2373_s8  ;;  %267 = vst [vmem:[#allocation1 + $0x2] ss:$4 sm:$0xff] %v2490_v0 }
  0x2f   : > { %v268_v3 = vld.sshfl [vmem:[#allocation1] sm:$0xff pattern:$0x73625140]  ;;  %v270_v4 = vld.sshfl [vmem:[#allocation1 + $0x8] sm:$0xff pattern:$0x73625140] }
  0x30   : > { %272 = vrot.lane.b32.xlu1 %v268_v3, %s2374_s9  ;;  %262 = vrot.lane.b32.xlu0 %v258_v2, %s2373_s8  ;;  %279 = vst [vmem:[#allocation1 + $0x3] ss:$4 sm:$0xff] %v2490_v0  ;;  %v504_v2 = vld [vmem:[%s3394_s2 + $0x130] sm:$0xff]  ;;  %v503_v3 = vld [vmem:[%s3394_s2 + $0x128] sm:$0xff] }
  0x37   : > { %v280_v5 = vld.sshfl [vmem:[#allocation1] sm:$0xff pattern:$0x73625140]  ;;  %v282_v6 = vld.sshfl [vmem:[#allocation1 + $0x8] sm:$0xff pattern:$0x73625140] }
  0x38   : > { %274 = vrot.lane.b32.xlu1 %v270_v4, %s2374_s9  ;;  %290 = vst [vmem:[#allocation1] ss:$4 sm:$0xff] %v2490_v0  ;;  %284 = vrot.lane.b32.xlu2 %v280_v5, %s2375_s10  ;;  %v499_v4 = vld [vmem:[%s3394_s2 + $0x108] sm:$0xff] }
  0x3f   : > { %v293_v7 = vld.sshfl [vmem:[#allocation1 + $0x8] sm:$0xff pattern:$0x73625140]  ;;  %v291_v8 = vld.sshfl [vmem:[#allocation1] sm:$0xff pattern:$0x73625140] }
  0x40   : > { %297 = vrot.lane.b32.xlu1 %v293_v7, %s2377_s12  ;;  %295 = vrot.lane.b32.xlu0 %v291_v8, %s2377_s12  ;;  %302 = vst [vmem:[#allocation1 + $0x1] ss:$4 sm:$0xff] %v2490_v0  ;;  %v507_v8 = vld [vmem:[%s3394_s2 + $0x148] sm:$0xff] }
  0x41   : > { %286 = vrot.lane.b32.xlu2 %v282_v6, %s2375_s10 }
  0x47   : > { %v303_v10 = vld.sshfl [vmem:[#allocation1] sm:$0xff pattern:$0x73625140]  ;;  %v305_v11 = vld.sshfl [vmem:[#allocation1 + $0x8] sm:$0xff pattern:$0x73625140] }
  0x48   : > { %309 = vrot.lane.b32.xlu0 %v305_v11, %s2378_s13  ;;  %314 = vst [vmem:[#allocation1 + $0x2] ss:$4 sm:$0xff] %v2490_v0 }
  0x49   : > { %307 = vrot.lane.b32.xlu2 %v303_v10, %s2378_s13  ;;  %v502_v10 = vld [vmem:[%s3394_s2 + $0x120] sm:$0xff]  ;;  %s2133_s13 = sshll.u32 %s2359_s22, 1 }
  0x4a   : > { %s1843_s15 = sadd.s32 %s2355_s21, %s2133_s13 }
  0x4f   : > { %v315_v12 = vld.sshfl [vmem:[#allocation1] sm:$0xff pattern:$0x73625140]  ;;  %v317_v13 = vld.sshfl [vmem:[#allocation1 + $0x8] sm:$0xff pattern:$0x73625140] }
  0x50   : > { %319 = vrot.lane.b32.xlu1 %v315_v12, %s2379_s14  ;;  %326 = vst [vmem:[#allocation1 + $0x3] ss:$4 sm:$0xff] %v2490_v0 }
  0x57   : > { %v327_v14 = vld.sshfl [vmem:[#allocation1] sm:$0xff pattern:$0x73625140]  ;;  %v329_v15 = vld.sshfl [vmem:[#allocation1 + $0x8] sm:$0xff pattern:$0x73625140] }
  0x58   : > { %321 = vrot.lane.b32.xlu1 %v317_v13, %s2379_s14  ;;  %337 = vst [vmem:[#allocation1] ss:$4 sm:$0xff] %v2490_v0  ;;  %s239_s14 = sand.u32 1, %s2347_s19  }
  0x59   : > { %s1936_s16 = sshll.u32 %s239_s14, 3  ;;  %s1833_s22 = scalar_lea.sflag [#allocation3], %s239_s14 }
  0x5a   : > { %s241_s8 = scalar_lea.vmem [#allocation2], %s1936_s16 }
  0x5b   : > { %s1847_s9 = sshll.u32 %s241_s8, 4  ;;  %s1848_s9 = int_to_ptr.vmem [resolvable:$true] %s1847_s9 }
  0x5f   : > { %v340_v17 = vld.sshfl [vmem:[#allocation1 + $0x8] sm:$0xff pattern:$0x73625140]  ;;  %v338_v18 = vld.sshfl [vmem:[#allocation1] sm:$0xff pattern:$0x73625140] }
  0x60   : > { %344 = vrot.lane.b32.xlu0 %v340_v17, %s2380_s17  ;;  %564 = vperm.xlu1 %2274, %v466_v16   ;;  %v510_v16 = vld [vmem:[%s3394_s2 + $0x160] sm:$0xff]  ;;  %v509_v17 = vld [vmem:[%s3394_s2 + $0x158] sm:$0xff] }
  0x61   : > { %342 = vrot.lane.b32.xlu2 %v338_v18, %s2380_s17  ;;  %v505_v18 = vld [vmem:[%s3394_s2 + $0x138] sm:$0xff]  ;;  %s2134_s17 = sshll.u32 %s1843_s15, 3 }
  0x68   : > { %333 = vrot.lane.b32.xlu0 %v329_v15, %s2381_s30  ;;  %579 = vperm.xlu1 %2274, %v469_v19  }
  0x69   : > { %331 = vrot.lane.b32.xlu2 %v327_v14, %s2381_s30  ;;  %s1845_s30 = scalar_lea.hbm %s3397_s5, %s2134_s17  ;;  %s2297_s17 = scalar_lea.hbm %s3397_s5, 32 }
  0x6a   : > { %s1849_s10 = sshll.u32 %s1845_s30, 4  ;;  %s1850_s10 = int_to_ptr.hbm [resolvable:$true] %s1849_s10 }
  0x6b   : > { %s2291_s21 = sshra.s32 %s1850_s10, 4  ;;  %s2292_s21 = int_to_ptr.hbm [resolvable:$true] %s2291_s21 }
  0x6c   : > { %s2293_s12 = scalar_lea.hbm %s2292_s21, 8  ;;  %p2298_p4 = scmp.lt.s32.totalorder %s2292_s21, %s3397_s5 }
  0x6d   : > { %p2294_p0 = scmp.ne.s32.totalorder %s2292_s21, %s2293_s12  ;;  %p2299_p5 = scmp.lt.s32.totalorder %s2297_s17, %s2293_s12 }
  0x6f   : > { %p2295_p1 = pnand %p2294_p0, %p2463_p3  ;;  %p2300_p6 = por %p2299_p5, %p2298_p4 }
  0x70   : > { %589 = vperm.xlu1 %2274, %v471_v20   ;;  %574 = vperm.xlu0 %2276, %v468_v21  }
  0x71   : > { %569 = vperm.xlu2 %2275, %v467_v22   ;;  %p2296_p2 = pneg %p2295_p1 }
  0x73   : > { %p2301_p7 = pnand %p2300_p6, %p2296_p2 }
  0x78   : > { %604 = vperm.xlu1 %2274, %v474_v23   ;;  %599 = vperm.xlu0 %2276, %v473_v24  }
  0x79   : > { %584 = vperm.xlu2 %2275, %v470_v25  }
  0x80   : > { %619 = vperm.xlu1 %2274, %v477_v26   ;;  %614 = vperm.xlu0 %2276, %v476_v27  }
  0x81   : > { %594 = vperm.xlu2 %2275, %v472_v28  }
  0x88   : > { %634 = vperm.xlu1 %2274, %v480_v29   ;;  %629 = vperm.xlu0 %2276, %v479_v30  }
  0x89   : > { %609 = vperm.xlu2 %2275, %v475_v31  }
  0x90   : > { %649 = vperm.xlu1 %2274, %v483_v32   ;;  %644 = vperm.xlu0 %2276, %v482_v33  }
  0x91   : > { %624 = vperm.xlu2 %2275, %v478_v34   ;;  %v512_v34 = vld [vmem:[%s3394_s2 + $0x170] sm:$0xff] }
  0x92   : > { %v2560_v38 = vpop.permute.xlu2 %284 }
  0x98   : > { %664 = vperm.xlu1 %2274, %v486_v35   ;;  %659 = vperm.xlu0 %2276, %v485_v36   ;;  %v2137_v36 = vld [vmem:[%s3393_s1] sm:$0xff] }
  0x99   : > { %639 = vperm.xlu2 %2275, %v481_v37   ;;  %v2152_v37 = vld [vmem:[%s3393_s1 + $0x78] sm:$0xff] }
  0x9a   : > { %v261_v47 = vpop.permute.xlu0 %260 }
  0x9b   : > { %v2582_v46 = vpop.permute.xlu2 %286 }
  0x9c   : > { %v289_v33 = vsel %vm288_vm9, %v2560_v38, %v2582_v46  ;;  %v508_v38 = vld [vmem:[%s3394_s2 + $0x150] sm:$0xff]  ;;  %v511_v46 = vld [vmem:[%s3394_s2 + $0x168] sm:$0xff] }
  0xa0   : > { %679 = vperm.xlu1 %2274, %v489_v39   ;;  %674 = vperm.xlu0 %2276, %v488_v40   ;;  %v2164_v39 = vld [vmem:[%s3393_s1 + $0xd8] sm:$0xff] }
  0xa1   : > { %654 = vperm.xlu2 %2275, %v484_v41   ;;  %v2176_v40 = vld [vmem:[%s3393_s1 + $0x138] sm:$0xff] }
  0xa2   : > { %v2571_v42 = vpop.permute.xlu1 %272  ;;  %v263_v55 = vpop.permute.xlu0 %262 }
  0xa3   : > { %v308_v52 = vpop.permute.xlu2 %307  ;;  %v265_v19 = vsel %vm264_vm2, %v261_v47, %v263_v55  ;;  %v2165_v55 = vld [vmem:[%s3393_s1 + $0xe0] sm:$0xff] }
  0xa4   : > { %v350_v23 = vsel %vm348_vm1, %v2490_v0, %v265_v19  ;;  %v513_v0 = vld [vmem:[%s3394_s2 + $0x178] sm:$0xff] }
  0xa8   : > { %694 = vperm.xlu1 %2274, %v492_v43   ;;  %689 = vperm.xlu0 %2276, %v491_v44   ;;  %v516_v44 = vld [vmem:[%s3394_s2 + $0x190] sm:$0xff] }
  0xa9   : > { %669 = vperm.xlu2 %2275, %v487_v45   ;;  %v515_v45 = vld [vmem:[%s3394_s2 + $0x188] sm:$0xff] }
  0xaa   : > { %v2590_v50 = vpop.permute.xlu1 %274 }
  0xab   : > { %v277_v24 = vsel %vm276_vm6, %v2571_v42, %v2590_v50  ;;  %v519_v50 = vld [vmem:[%s3394_s2 + $0x1a8] sm:$0xff] }
  0xac   : > { %v353_v32 = vsel %vm351_vm8, %v350_v23, %v277_v24  ;;  %v560_v23 = vld [vmem:[%s3394_s2 + $0x2f0] sm:$0xff]  ;;  %v2140_v24 = vld [vmem:[%s3393_s1 + $0x18] sm:$0xff] }
  0xad   : > { %v356_v35 = vsel %vm354_vm10, %v353_v32, %v289_v33 }
  0xb0   : > { %709 = vperm.xlu1 %2274, %v495_v48   ;;  %704 = vperm.xlu0 %2276, %v494_v49  }
  0xb1   : > { %684 = vperm.xlu2 %2275, %v490_v51   ;;  %v518_v51 = vld [vmem:[%s3394_s2 + $0x1a0] sm:$0xff] }
  0xb2   : > { %v298_v57 = vpop.permute.xlu1 %297  ;;  %v296_v62 = vpop.permute.xlu0 %295 }
  0xb3   : > { %v300_v20 = vsel %vm299_vm3, %v296_v62, %v298_v57  ;;  %v517_v62 = vld [vmem:[%s3394_s2 + $0x198] sm:$0xff] }
  0xb8   : > { %724 = vperm.xlu1 %2274, %v498_v53   ;;  %719 = vperm.xlu0 %2276, %v497_v54   ;;  %v2153_v53 = vld [vmem:[%s3393_s1 + $0x80] sm:$0xff] }
  0xb9   : > { %699 = vperm.xlu2 %2275, %v493_v56   ;;  %v514_v54 = vld [vmem:[%s3394_s2 + $0x180] sm:$0xff] }
  0xba   : > { %v310_v5 = vpop.permute.xlu0 %309  ;;  %v2177_v56 = vld [vmem:[%s3393_s1 + $0x140] sm:$0xff] }
  0xbb   : > { %v343_v58 = vpop.permute.xlu2 %342  ;;  %v312_v21 = vsel %vm311_vm4, %v308_v52, %v310_v5  ;;  %v2138_v52 = vld [vmem:[%s3393_s1 + $0x8] sm:$0xff]  ;;  %v2139_v5 = vld [vmem:[%s3393_s1 + $0x10] sm:$0xff] }
  0xbc   : > { %v360_v25 = vsel %vm348_vm1, %v300_v20, %v312_v21 }
  0xc0   : > { %739 = vperm.xlu1 %2274, %v501_v59   ;;  %734 = vperm.xlu0 %2276, %v500_v60   ;;  %v522_v60 = vld [vmem:[%s3394_s2 + $0x1c0] sm:$0xff] }
  0xc1   : > { %714 = vperm.xlu2 %2275, %v496_v61   ;;  %v521_v61 = vld [vmem:[%s3394_s2 + $0x1b8] sm:$0xff] }
  0xc2   : > { %v320_v63 = vpop.permute.xlu1 %319 }
  0xc3   : > { %v332_v1 = vpop.permute.xlu2 %331 }
  0xc8   : > { %754 = vperm.xlu1 %2274, %v504_v2   ;;  %749 = vperm.xlu0 %2276, %v503_v3   ;;  %v525_v3 = vld [vmem:[%s3394_s2 + $0x1d8] sm:$0xff] }
  0xc9   : > { %729 = vperm.xlu2 %2275, %v499_v4   ;;  %v524_v4 = vld [vmem:[%s3394_s2 + $0x1d0] sm:$0xff] }
  0xca   : > { %v322_v6 = vpop.permute.xlu1 %321 }
  0xcb   : > { %v2622_v7 = vpop.permute.xlu2 %569  ;;  %v324_v22 = vsel %vm323_vm5, %v320_v63, %v322_v6  ;;  %v2154_v6 = vld [vmem:[%s3393_s1 + $0x88] sm:$0xff] }
  0xcc   : > { %v362_v28 = vsel %vm351_vm8, %v360_v25, %v324_v22  ;;  %v561_v22 = vld [vmem:[%s3394_s2 + $0x2f8] sm:$0xff]  ;;  %v2155_v25 = vld [vmem:[%s3393_s1 + $0x90] sm:$0xff] }
  0xd0   : > { %769 = vperm.xlu1 %2274, %v507_v8   ;;  %764 = vperm.xlu0 %2276, %v506_v9   ;;  %v520_v8 = vld [vmem:[%s3394_s2 + $0x1b0] sm:$0xff]  ;;  %v2166_v9 = vld [vmem:[%s3393_s1 + $0xe8] sm:$0xff] }
  0xd1   : > { %744 = vperm.xlu2 %2275, %v502_v10   ;;  %v2178_v10 = vld [vmem:[%s3393_s1 + $0x148] sm:$0xff] }
  0xd2   : > { %v345_v11 = vpop.permute.xlu0 %344  ;;  %v2633_v12 = vpop.permute.xlu1 %564 }
  0xd3   : > { %v347_v13 = vsel %vm346_vm0, %v343_v58, %v345_v11  ;;  %v2635_v14 = vpop.permute.xlu2 %584 }
  0xd4   : > { %v368_v15 = vsel %vm348_vm1, %v347_v13, 0 }
  0xd5   : > { %1335 = vmatpush.bf16.msra.mxu0 %v368_v15  ;;  %2185 = vmatpush.bf16.msra.mxu1 %v368_v15 }
  0xd6   : > { %2186 = vmatpush.bf16.msra.mxu2 %v368_v15  ;;  %2187 = vmatpush.bf16.msra.mxu3 %v368_v15 }
  0xd8   : > { %784 = vperm.xlu1 %2274, %v510_v16   ;;  %779 = vperm.xlu0 %2276, %v509_v17   ;;  %v544_v16 = vld [vmem:[%s3394_s2 + $0x270] sm:$0xff]  ;;  %v527_v17 = vld [vmem:[%s3394_s2 + $0x1e8] sm:$0xff] }
  0xd9   : > { %759 = vperm.xlu2 %2275, %v505_v18   ;;  %v523_v18 = vld [vmem:[%s3394_s2 + $0x1c8] sm:$0xff] }
  0xda   : > { %v334_v26 = vpop.permute.xlu0 %333  ;;  %v2652_v27 = vpop.permute.xlu1 %579 }
  0xdb   : > { %v336_v29 = vsel %vm335_vm7, %v332_v1, %v334_v26  ;;  %v2654_v30 = vpop.permute.xlu2 %594  ;;  %v526_v26 = vld [vmem:[%s3394_s2 + $0x1e0] sm:$0xff] }
  0xdc   : > { %v364_v31 = vsel %vm354_vm10, %v362_v28, %v336_v29  ;;  %v2167_v28 = vld [vmem:[%s3393_s1 + $0xf0] sm:$0xff] }
  0xdd   : > { %1336 = vmatpush.bf16.msra.mxu0 %v364_v31  ;;  %2188 = vmatpush.bf16.msra.mxu1 %v364_v31  ;;  %v2179_v29 = vld [vmem:[%s3393_s1 + $0x150] sm:$0xff] }
  0xde   : > { %2189 = vmatpush.bf16.msra.mxu2 %v364_v31  ;;  %2190 = vmatpush.bf16.msra.mxu3 %v364_v31 }
  0xe0   : > { %799 = vperm.xlu1 %2274, %v513_v0   ;;  %794 = vperm.xlu0 %2276, %v512_v34   ;;  %v558_v0 = vld [vmem:[%s3394_s2 + $0x2e0] sm:$0xff]  ;;  %v543_v34 = vld [vmem:[%s3394_s2 + $0x268] sm:$0xff] }
  0xe1   : > { %1337 = vmatpush.bf16.msra.mxu0 %v356_v35  ;;  %2191 = vmatpush.bf16.msra.mxu1 %v356_v35 }
  0xe2   : > { %2192 = vmatpush.bf16.msra.mxu2 %v356_v35  ;;  %2193 = vmatpush.bf16.msra.mxu3 %v356_v35  ;;  %v2679_v41 = vpop.permute.xlu1 %589  ;;  %v2681_v42 = vpop.permute.xlu0 %574  ;;  %v545_v35 = vld [vmem:[%s3394_s2 + $0x278] sm:$0xff] }
  0xe3   : > { %774 = vperm.xlu2 %2275, %v508_v38   ;;  %v2683_v43 = vpop.permute.xlu2 %609 }
  0xe4   : > { %1338 = vmatmul.bf16.vlgmr.msra.gmra.mxu0 %v2137_v36  ;;  %1413 = vmatmul.bf16.vlgmr.msra.gmra.mxu1 %v2152_v37 }
  0xe5   : > { %1473 = vmatmul.bf16.vlgmr.msra.gmra.mxu2 %v2164_v39  ;;  %1533 = vmatmul.bf16.vlgmr.msra.gmra.mxu3 %v2176_v40  ;;  %v529_v39 = vld [vmem:[%s3394_s2 + $0x1f8] sm:$0xff]  ;;  %v528_v40 = vld [vmem:[%s3394_s2 + $0x1f0] sm:$0xff] }
  0xe8   : > { %814 = vperm.xlu1 %2274, %v516_v44   ;;  %809 = vperm.xlu0 %2276, %v515_v45   ;;  %v2141_v44 = vld [vmem:[%s3393_s1 + $0x20] sm:$0xff]  ;;  %v2156_v45 = vld [vmem:[%s3393_s1 + $0x98] sm:$0xff] }
  0xea   : > { %v2694_v47 = vpop.permute.xlu1 %604  ;;  %v2696_v48 = vpop.permute.xlu0 %599 }
  0xeb   : > { %789 = vperm.xlu2 %2275, %v511_v46   ;;  %v2698_v49 = vpop.permute.xlu2 %624  ;;  %v542_v46 = vld [vmem:[%s3394_s2 + $0x260] sm:$0xff] }
  0xf0   : > { %829 = vperm.xlu1 %2274, %v519_v50   ;;  %824 = vperm.xlu0 %2276, %v518_v51   ;;  %v2168_v50 = vld [vmem:[%s3393_s1 + $0xf8] sm:$0xff] }
  0xf1   : > { %v2180_v51 = vld [vmem:[%s3393_s1 + $0x158] sm:$0xff] }
  0xf2   : > { %v2721_v57 = vpop.permute.xlu1 %619  ;;  %v2723_v58 = vpop.permute.xlu0 %614 }
  0xf3   : > { %804 = vperm.xlu2 %2275, %v514_v54   ;;  %v2725_v59 = vpop.permute.xlu2 %639 }
  0xf4   : > { %1343 = vmatmul.bf16.gmra.mxu0 %v2138_v52  ;;  %1418 = vmatmul.bf16.gmra.mxu1 %v2153_v53 }
  0xf5   : > { %1478 = vmatmul.bf16.gmra.mxu2 %v2165_v55  ;;  %1538 = vmatmul.bf16.gmra.mxu3 %v2177_v56  ;;  %v556_v55 = vld [vmem:[%s3394_s2 + $0x2d0] sm:$0xff]  ;;  %v541_v56 = vld [vmem:[%s3394_s2 + $0x258] sm:$0xff] }
  0xf8   : > { %844 = vperm.xlu1 %2274, %v522_v60   ;;  %839 = vperm.xlu0 %2276, %v521_v61   ;;  %v559_v60 = vld [vmem:[%s3394_s2 + $0x2e8] sm:$0xff] }
  0xfa   : > { %v2736_v63 = vpop.permute.xlu1 %634  ;;  %v2738_v1 = vpop.permute.xlu0 %629 }
  0xfb   : > { %819 = vperm.xlu2 %2275, %v517_v62   ;;  %v2740_v2 = vpop.permute.xlu2 %654 }
 0x100   : > { %859 = vperm.xlu1 %2274, %v525_v3   ;;  %854 = vperm.xlu0 %2276, %v524_v4   ;;  %v539_v4 = vld [vmem:[%s3394_s2 + $0x248] sm:$0xff] }
 0x102   : > { %v2763_v11 = vpop.permute.xlu1 %649  ;;  %v2765_v13 = vpop.permute.xlu0 %644 }
 0x103   : > { %834 = vperm.xlu2 %2275, %v520_v8   ;;  %v2767_v15 = vpop.permute.xlu2 %669  ;;  %v2157_v8 = vld [vmem:[%s3393_s1 + $0xa0] sm:$0xff] }
 0x104   : > { %3400 = vst [vmem:[#allocation5_spill] sm:$0xff] %v2767_v15  ;;  %1348 = vmatmul.bf16.gmra.mxu0 %v2139_v5  ;;  %1423 = vmatmul.bf16.gmra.mxu1 %v2154_v6  ;;  %v538_v5 = vld [vmem:[%s3394_s2 + $0x240] sm:$0xff]  ;;  %v2142_v6 = vld [vmem:[%s3393_s1 + $0x28] sm:$0xff] }
 0x105   : > { %1483 = vmatmul.bf16.gmra.mxu2 %v2166_v9  ;;  %1543 = vmatmul.bf16.gmra.mxu3 %v2178_v10  ;;  %v540_v9 = vld [vmem:[%s3394_s2 + $0x250] sm:$0xff]  ;;  %v2169_v10 = vld [vmem:[%s3393_s1 + $0x100] sm:$0xff] }
 0x108   : > { %954 = vperm.xlu1 %2274, %v544_v16   ;;  %869 = vperm.xlu0 %2276, %v527_v17   ;;  %v2181_v16 = vld [vmem:[%s3393_s1 + $0x160] sm:$0xff] }
 0x10a   : > { %v2778_v19 = vpop.permute.xlu1 %664  ;;  %v2780_v20 = vpop.permute.xlu0 %659 }
 0x10b   : > { %3401 = vst [vmem:[#allocation6_spill] sm:$0xff] %v2778_v19  ;;  %849 = vperm.xlu2 %2275, %v523_v18   ;;  %v2782_v21 = vpop.permute.xlu2 %684 }
 0x10c   : > { %3402 = vst [vmem:[#allocation7_spill] sm:$0xff] %v2780_v20 }
 0x10d   : > { %3403 = vst [vmem:[#allocation8_spill] sm:$0xff] %v2782_v21 }
 0x110   : > { %1039 = vperm.xlu1 %2274, %v561_v22   ;;  %1034 = vperm.xlu0 %2276, %v560_v23   ;;  %v536_v23 = vld [vmem:[%s3394_s2 + $0x230] sm:$0xff] }
 0x112   : > { %v2805_v31 = vpop.permute.xlu1 %679  ;;  %v2807_v32 = vpop.permute.xlu0 %674 }
 0x113   : > { %3404 = vst [vmem:[#allocation9_spill] sm:$0xff] %v2805_v31  ;;  %864 = vperm.xlu2 %2275, %v526_v26   ;;  %v2809_v33 = vpop.permute.xlu2 %699 }
 0x114   : > { %3405 = vst [vmem:[#allocation10_spill] sm:$0xff] %v2807_v32  ;;  %1353 = vmatmul.bf16.gmra.mxu0 %v2140_v24  ;;  %1428 = vmatmul.bf16.gmra.mxu1 %v2155_v25  ;;  %v555_v24 = vld [vmem:[%s3394_s2 + $0x2c8] sm:$0xff]  ;;  %v557_v25 = vld [vmem:[%s3394_s2 + $0x2d8] sm:$0xff] }
 0x115   : > { %3406 = vst [vmem:[#allocation11_spill] sm:$0xff] %v2809_v33  ;;  %1488 = vmatmul.bf16.gmra.mxu2 %v2167_v28  ;;  %1548 = vmatmul.bf16.gmra.mxu3 %v2179_v29  ;;  %v553_v29 = vld [vmem:[%s3394_s2 + $0x2b8] sm:$0xff] }
 0x118   : > { %1024 = vperm.xlu1 %2274, %v558_v0   ;;  %949 = vperm.xlu0 %2276, %v543_v34   ;;  %v552_v0 = vld [vmem:[%s3394_s2 + $0x2b0] sm:$0xff] }
 0x11a   : > { %v2820_v36 = vpop.permute.xlu1 %694  ;;  %v2822_v37 = vpop.permute.xlu0 %689 }
 0x11b   : > { %3407 = vst [vmem:[#allocation12_spill] sm:$0xff] %v2820_v36  ;;  %959 = vperm.xlu2 %2275, %v545_v35   ;;  %v2824_v38 = vpop.permute.xlu2 %714  ;;  %v2143_v35 = vld [vmem:[%s3393_s1 + $0x30] sm:$0xff] }
 0x11c   : > { %3408 = vst [vmem:[#allocation13_spill] sm:$0xff] %v2822_v37  ;;  %v531_v37 = vld [vmem:[%s3394_s2 + $0x208] sm:$0xff] }
 0x120   : > { %879 = vperm.xlu1 %2274, %v529_v39   ;;  %874 = vperm.xlu0 %2276, %v528_v40   ;;  %v2158_v39 = vld [vmem:[%s3393_s1 + $0xa8] sm:$0xff]  ;;  %v554_v40 = vld [vmem:[%s3394_s2 + $0x2c0] sm:$0xff] }
 0x122   : > { %v2847_v52 = vpop.permute.xlu1 %709  ;;  %v2849_v53 = vpop.permute.xlu0 %704 }
 0x123   : > { %3409 = vst [vmem:[#allocation14_spill] sm:$0xff] %v2847_v52  ;;  %944 = vperm.xlu2 %2275, %v542_v46   ;;  %v2851_v54 = vpop.permute.xlu2 %729 }
 0x124   : > { %3410 = vst [vmem:[#allocation15_spill] sm:$0xff] %v2849_v53  ;;  %1358 = vmatmul.bf16.gmra.mxu0 %v2141_v44  ;;  %1433 = vmatmul.bf16.gmra.mxu1 %v2156_v45  ;;  %v2170_v44 = vld [vmem:[%s3393_s1 + $0x108] sm:$0xff] }
 0x125   : > { %3411 = vst [vmem:[#allocation16_spill] sm:$0xff] %v2851_v54  ;;  %1493 = vmatmul.bf16.gmra.mxu2 %v2168_v50  ;;  %1553 = vmatmul.bf16.gmra.mxu3 %v2180_v51  ;;  %v2182_v45 = vld [vmem:[%s3393_s1 + $0x168] sm:$0xff]  ;;  %v550_v51 = vld [vmem:[%s3394_s2 + $0x2a0] sm:$0xff] }
 0x128   : > { %1014 = vperm.xlu1 %2274, %v556_v55   ;;  %939 = vperm.xlu0 %2276, %v541_v56   ;;  %v535_v55 = vld [vmem:[%s3394_s2 + $0x228] sm:$0xff] }
 0x12a   : > { %v2862_v61 = vpop.permute.xlu1 %724  ;;  %v2864_v62 = vpop.permute.xlu0 %719 }
 0x12b   : > { %1029 = vperm.xlu2 %2275, %v559_v60   ;;  %v2866_v3 = vpop.permute.xlu2 %744  ;;  %v537_v60 = vld [vmem:[%s3394_s2 + $0x238] sm:$0xff] }
 0x130   : > { %929 = vperm.xlu1 %2274, %v539_v4   ;;  %924 = vperm.xlu0 %2276, %v538_v5  }
 0x132   : > { %v2889_v17 = vpop.permute.xlu1 %739  ;;  %v2891_v18 = vpop.permute.xlu0 %734 }
 0x133   : > { %934 = vperm.xlu2 %2275, %v540_v9   ;;  %v2893_v22 = vpop.permute.xlu2 %759 }
 0x134   : > { %1363 = vmatmul.bf16.gmra.mxu0 %v2142_v6  ;;  %1438 = vmatmul.bf16.gmra.mxu1 %v2157_v8  ;;  %v533_v6 = vld [vmem:[%s3394_s2 + $0x218] sm:$0xff]  ;;  %v532_v8 = vld [vmem:[%s3394_s2 + $0x210] sm:$0xff] }
 0x135   : > { %1498 = vmatmul.bf16.gmra.mxu2 %v2169_v10  ;;  %1558 = vmatmul.bf16.gmra.mxu3 %v2181_v16  ;;  %v2144_v10 = vld [vmem:[%s3393_s1 + $0x38] sm:$0xff]  ;;  %v2159_v16 = vld [vmem:[%s3393_s1 + $0xb0] sm:$0xff] }
 0x138   : > { %914 = vperm.xlu1 %2274, %v536_v23   ;;  %1009 = vperm.xlu0 %2276, %v555_v24   ;;  %v534_v23 = vld [vmem:[%s3394_s2 + $0x220] sm:$0xff]  ;;  %v2171_v24 = vld [vmem:[%s3393_s1 + $0x110] sm:$0xff] }
 0x13a   : > { %v2904_v26 = vpop.permute.xlu1 %754  ;;  %v2906_v28 = vpop.permute.xlu0 %749 }
 0x13b   : > { %1019 = vperm.xlu2 %2275, %v557_v25   ;;  %v2183_v25 = vld [vmem:[%s3393_s1 + $0x170] sm:$0xff] }
 0x13d   : > { %v2914_v34 = vpop.permute.xlu2 %774 }
 0x140   : > { %999 = vperm.xlu1 %2274, %v553_v29   ;;  %994 = vperm.xlu0 %2276, %v552_v0  }
 0x142   : > { %v2931_v46 = vpop.permute.xlu1 %769  ;;  %v2933_v50 = vpop.permute.xlu0 %764 }
 0x143   : > { %1004 = vperm.xlu2 %2275, %v554_v40  }
 0x144   : > { %1368 = vmatmul.bf16.gmra.mxu0 %v2143_v35  ;;  %1443 = vmatmul.bf16.gmra.mxu1 %v2158_v39  ;;  %v530_v35 = vld [vmem:[%s3394_s2 + $0x200] sm:$0xff]  ;;  %v549_v39 = vld [vmem:[%s3394_s2 + $0x298] sm:$0xff] }
 0x145   : > { %1503 = vmatmul.bf16.gmra.mxu2 %v2170_v44  ;;  %1563 = vmatmul.bf16.gmra.mxu3 %v2182_v45  ;;  %v2941_v56 = vpop.permute.xlu2 %789  ;;  %v551_v44 = vld [vmem:[%s3394_s2 + $0x2a8] sm:$0xff] }
 0x148   : > { %984 = vperm.xlu1 %2274, %v550_v51   ;;  %909 = vperm.xlu0 %2276, %v535_v55   ;;  %v547_v55 = vld [vmem:[%s3394_s2 + $0x288] sm:$0xff] }
 0x14a   : > { %v2946_v4 = vpop.permute.xlu1 %784  ;;  %v2948_v5 = vpop.permute.xlu0 %779 }
 0x14b   : > { %919 = vperm.xlu2 %2275, %v537_v60   ;;  %v546_v60 = vld [vmem:[%s3394_s2 + $0x280] sm:$0xff] }
 0x14d   : > { %v2956_v9 = vpop.permute.xlu2 %804 }
 0x14e   : > { %3412 = vst [vmem:[#allocation17_spill] sm:$0xff] %v2956_v9 }
 0x150   : > { %899 = vperm.xlu1 %2274, %v533_v6   ;;  %894 = vperm.xlu0 %2276, %v532_v8   ;;  %v2145_v8 = vld [vmem:[%s3393_s1 + $0x40] sm:$0xff] }
 0x152   : > { %v2973_v29 = vpop.permute.xlu1 %799  ;;  %v2975_v0 = vpop.permute.xlu0 %794 }
 0x153   : > { %904 = vperm.xlu2 %2275, %v534_v23  }
 0x154   : > { %1373 = vmatmul.bf16.gmra.mxu0 %v2144_v10  ;;  %1448 = vmatmul.bf16.gmra.mxu1 %v2159_v16  ;;  %v2160_v10 = vld [vmem:[%s3393_s1 + $0xb8] sm:$0xff]  ;;  %v548_v16 = vld [vmem:[%s3394_s2 + $0x290] sm:$0xff] }
 0x155   : > { %1508 = vmatmul.bf16.gmra.mxu2 %v2171_v24  ;;  %1568 = vmatmul.bf16.gmra.mxu3 %v2183_v25  ;;  %v2983_v40 = vpop.permute.xlu2 %819  ;;  %v2172_v25 = vld [vmem:[%s3393_s1 + $0x118] sm:$0xff] }
 0x156   : > { %3413 = vst [vmem:[#allocation18_spill] sm:$0xff] %v2983_v40 }
 0x158   : > { %884 = vperm.xlu1 %2274, %v530_v35   ;;  %979 = vperm.xlu0 %2276, %v549_v39   ;;  %v2184_v35 = vld [vmem:[%s3393_s1 + $0x178] sm:$0xff] }
 0x15a   : > { %v2988_v45 = vpop.permute.xlu1 %814  ;;  %v2990_v51 = vpop.permute.xlu0 %809 }
 0x15b   : > { %3414 = vst [vmem:[#allocation19_spill] sm:$0xff] %v2988_v45  ;;  %989 = vperm.xlu2 %2275, %v551_v44  }
 0x15c   : > { %3415 = vst [vmem:[#allocation20_spill] sm:$0xff] %v2990_v51 }
 0x15d   : > { %v835_v6 = vpop.permute.xlu2 %834 }
 0x160   : > { %969 = vperm.xlu1 %2274, %v547_v55   ;;  %964 = vperm.xlu0 %2276, %v546_v60  }
 0x161   : > { %v1339_v23 = vpop.f32.mrf.mxu0  ;;  %v1414_v24 = vpop.f32.mrf.mxu1 }
 0x162   : > { %v3013_v39 = vpop.permute.xlu1 %829  ;;  %v3015_v44 = vpop.permute.xlu0 %824  ;;  %v1415_v60 = vadd.f32 %v1414_v24, %v2824_v38  ;;  %v1340_v32 = vadd.f32 %v1339_v23, %v2633_v12 }
 0x163   : > { %3416 = vst [vmem:[#allocation21_spill] sm:$0xff] %v3013_v39  ;;  %974 = vperm.xlu2 %2275, %v548_v16  }
 0x164   : > { %3417 = vst [vmem:[#allocation22_spill] sm:$0xff] %v3015_v44  ;;  %1378 = vmatmul.bf16.gmra.mxu0 %v2145_v8  ;;  %1453 = vmatmul.bf16.gmra.mxu1 %v2160_v10  ;;  %v1609_v16 = vmax.f32 %v1415_v60, 0.0  ;;  %v1579_v38 = vmax.f32 %v1340_v32, 0.0  ;;  %v1726_v32 = vld [vmem:[%s3396_s4] sm:$0xff] }
 0x165   : > { %1513 = vmatmul.bf16.gmra.mxu2 %v2172_v25  ;;  %1573 = vmatmul.bf16.gmra.mxu3 %v2184_v35  ;;  %v3017_v55 = vpop.permute.xlu2 %849 }
 0x166   : > { %3418 = vst [vmem:[#allocation23_spill] sm:$0xff] %v3017_v55 }
 0x168   : > { %v1474_v31 = vpop.f32.mrf.mxu2  ;;  %v1534_v21 = vpop.f32.mrf.mxu3 }
 0x169   : > { %v1341_v36 = vpop.f32.mrf.mxu0  ;;  %v1416_v52 = vpop.f32.mrf.mxu1  ;;  %v1475_v33 = vadd.f32 %v1474_v31, %v835_v6  ;;  %v2146_v31 = vld [vmem:[%s3393_s1 + $0x48] sm:$0xff] }
 0x16a   : > { %v1342_v8 = vadd.f32 %v1341_v36, %v2622_v7  ;;  %v1417_v10 = vadd.f32 %v1416_v52, %v2864_v62  ;;  %v845_v25 = vpop.permute.xlu1 %844  ;;  %v840_v35 = vpop.permute.xlu0 %839  ;;  %v2161_v7 = vld [vmem:[%s3393_s1 + $0xc0] sm:$0xff] }
 0x16b   : > { %889 = vperm.xlu2 %2275, %v531_v37   ;;  %v1633_v52 = vmax.f32 %v1475_v33, 0.0  ;;  %v2173_v62 = vld [vmem:[%s3393_s1 + $0x120] sm:$0xff] }
 0x16c   : > { %v1580_v24 = vmax.f32 %v1342_v8, 0.0  ;;  %v1610_v12 = vmax.f32 %v1417_v10, 0.0 }
 0x16d   : > { %v3026_v23 = vpop.permute.xlu2 %864 }
 0x16e   : > { %3419 = vst [vmem:[#allocation24_spill] sm:$0xff] %v3026_v23  ;;  %v1693_v53 = vpack.c.bf16 %v1610_v12, %v1609_v16  ;;  %v3028_v9 = vpack.c.bf16 %v1580_v24, %v1579_v38 }
 0x170   : > { %3420 = vst [vmem:[#allocation25_spill] sm:$0xff] %v3028_v9  ;;  %v1476_v51 = vpop.f32.mrf.mxu2  ;;  %v1536_v45 = vpop.f32.mrf.mxu3  ;;  %1766 = vmatpush.bf16.msrb.mxu2 %v1693_v53 }
 0x171   : > { %v1344_v36 = vpop.f32.mrf.mxu0  ;;  %v1419_v37 = vpop.f32.mrf.mxu1  ;;  %v1477_v6 = vadd.f32 %v1476_v51, %v840_v35 }
 0x172   : > { %v3043_v60 = vadd.f32 %v1419_v37, %v2862_v61  ;;  %v3045_v16 = vpop.permute.xlu1 %859  ;;  %v3047_v8 = vpop.permute.xlu0 %854  ;;  %v1345_v24 = vadd.f32 %v1344_v36, %v2681_v42 }
 0x173   : > { %3422 = vst [vmem:[#allocation27_spill] sm:$0xff] %v3045_v16  ;;  %v1634_v10 = vmax.f32 %v1477_v6, 0.0  ;;  %1729 = vperm.xlu2 %2275, %v1726_v32  }
 0x174   : > { %3421 = vst [vmem:[#allocation26_spill] sm:$0xff] %v3043_v60  ;;  %1383 = vmatmul.bf16.gmra.mxu0 %v2146_v31  ;;  %1458 = vmatmul.bf16.gmra.mxu1 %v2161_v7 }
 0x175   : > { %3423 = vst [vmem:[#allocation28_spill] sm:$0xff] %v3047_v8  ;;  %1518 = vmatmul.bf16.gmra.mxu2 %v2173_v62  ;;  %v3049_v53 = vpack.c.bf16 %v1634_v10, %v1633_v52  ;;  %v960_v33 = vpop.permute.xlu2 %959  ;;  %v1581_v62 = vmax.f32 %v1345_v24, 0.0 }
 0x176   : > { %v1537_v38 = vadd.f32 %v1536_v45, %v960_v33 }
 0x177   : > { %3424 = vst [vmem:[#allocation29_spill] sm:$0xff] %v3049_v53 }
 0x178   : > { %v1479_v12 = vpop.f32.mrf.mxu2  ;;  %v3052_v51 = vpop.f32.mrf.mxu3  ;;  %v1658_v52 = vmax.f32 %v1537_v38, 0.0 }
 0x179   : > { %3425 = vst [vmem:[#allocation30_spill] sm:$0xff] %v3052_v51  ;;  %v3054_v61 = vadd.f32 %v1479_v12, %v845_v25  ;;  %v1346_v35 = vpop.f32.mrf.mxu0  ;;  %v3056_v37 = vpop.f32.mrf.mxu1 }
 0x17a   : > { %3427 = vst [vmem:[#allocation32_spill] sm:$0xff] %v3056_v37  ;;  %v1347_v6 = vadd.f32 %v1346_v35, %v2652_v27  ;;  %v955_v32 = vpop.permute.xlu1 %954  ;;  %v3059_v31 = vpop.permute.xlu0 %869  ;;  %v2147_v27 = vld [vmem:[%s3393_s1 + $0x50] sm:$0xff]  ;;  %v2174_v35 = vld [vmem:[%s3393_s1 + $0x128] sm:$0xff] }
 0x17b   : > { %3426 = vst [vmem:[#allocation31_spill] sm:$0xff] %v3054_v61  ;;  %v1535_v7 = vadd.f32 %v1534_v21, %v955_v32  ;;  %v2162_v21 = vld [vmem:[%s3393_s1 + $0xc8] sm:$0xff] }
 0x17c   : > { %v1582_v10 = vmax.f32 %v1347_v6, 0.0 }
 0x17d   : > { %v1657_v45 = vmax.f32 %v1535_v7, 0.0  ;;  %v3061_v33 = vpop.permute.xlu2 %944 }
 0x17e   : > { %3428 = vst [vmem:[#allocation33_spill] sm:$0xff] %v3061_v33  ;;  %v3063_v42 = vpack.c.bf16 %v1582_v10, %v1581_v62 }
 0x17f   : > { %v3065_v36 = vpack.c.bf16 %v1658_v52, %v1657_v45 }
 0x180   : > { %3429 = vst [vmem:[#allocation34_spill] sm:$0xff] %v3063_v42  ;;  %v3067_v25 = vpop.f32.mrf.mxu2  ;;  %v3069_v12 = vpop.f32.mrf.mxu3 }
 0x181   : > { %3430 = vst [vmem:[#allocation35_spill] sm:$0xff] %v3065_v36  ;;  %v1349_v38 = vpop.f32.mrf.mxu0  ;;  %v1424_v24 = vpop.f32.mrf.mxu1 }
 0x182   : > { %3431 = vst [vmem:[#allocation36_spill] sm:$0xff] %v3067_v25  ;;  %v3080_v6 = vpop.permute.xlu1 %1039  ;;  %v3082_v32 = vpop.permute.xlu0 %1034  ;;  %v1425_v52 = vadd.f32 %v1424_v24, %v2891_v18  ;;  %v1350_v62 = vadd.f32 %v1349_v38, %v2635_v14 }
 0x183   : > { %3432 = vst [vmem:[#allocation37_spill] sm:$0xff] %v3069_v12 }
 0x184   : > { %3433 = vst [vmem:[#allocation38_spill] sm:$0xff] %v3080_v6  ;;  %1388 = vmatmul.bf16.gmra.mxu0 %v2147_v27  ;;  %1463 = vmatmul.bf16.gmra.mxu1 %v2162_v21  ;;  %v1613_v51 = vmax.f32 %v1425_v52, 0.0 }
 0x185   : > { %3434 = vst [vmem:[#allocation39_spill] sm:$0xff] %v3082_v32  ;;  %1523 = vmatmul.bf16.gmra.mxu2 %v2174_v35  ;;  %v3084_v7 = vpop.permute.xlu2 %1029  ;;  %v1583_v35 = vmax.f32 %v1350_v62, 0.0 }
 0x186   : > { %3435 = vst [vmem:[#allocation40_spill] sm:$0xff] %v3084_v7 }
 0x188   : > { %v3088_v10 = vpop.f32.mrf.mxu2  ;;  %v3090_v45 = vpop.f32.mrf.mxu3 }
 0x189   : > { %3436 = vst [vmem:[#allocation41_spill] sm:$0xff] %v3088_v10  ;;  %v1351_v36 = vpop.f32.mrf.mxu0  ;;  %v1426_v33 = vpop.f32.mrf.mxu1 }
 0x18a   : > { %v1352_v12 = vadd.f32 %v1351_v36, %v2679_v41  ;;  %v1427_v39 = vadd.f32 %v1426_v33, %v2889_v17  ;;  %v3094_v27 = vpop.permute.xlu1 %1024  ;;  %v3096_v21 = vpop.permute.xlu0 %949  ;;  %v2148_v41 = vld [vmem:[%s3393_s1 + $0x58] sm:$0xff]  ;;  %v2163_v17 = vld [vmem:[%s3393_s1 + $0xd0] sm:$0xff] }
 0x18b   : > { %3437 = vst [vmem:[#allocation42_spill] sm:$0xff] %v3094_v27 }
 0x18c   : > { %3438 = vst [vmem:[#allocation43_spill] sm:$0xff] %v3096_v21  ;;  %v1584_v40 = vmax.f32 %v1352_v12, 0.0  ;;  %v1614_v18 = vmax.f32 %v1427_v39, 0.0 }
 0x18d   : > { %v3098_v24 = vpop.permute.xlu2 %934 }
 0x18e   : > { %3439 = vst [vmem:[#allocation44_spill] sm:$0xff] %v3098_v24  ;;  %v3100_v14 = vpack.c.bf16 %v1584_v40, %v1583_v35  ;;  %v3102_v38 = vpack.c.bf16 %v1614_v18, %v1613_v51  ;;  %v2175_v40 = vld [vmem:[%s3393_s1 + $0x130] sm:$0xff] }
 0x190   : > { %3440 = vst [vmem:[#allocation45_spill] sm:$0xff] %v3102_v38  ;;  %v3104_v44 = vpop.f32.mrf.mxu2  ;;  %v3106_v52 = vpop.f32.mrf.mxu3 }
 0x191   : > { %3441 = vst [vmem:[#allocation46_spill] sm:$0xff] %v3104_v44  ;;  %v1354_v33 = vpop.f32.mrf.mxu0  ;;  %v1429_v39 = vpop.f32.mrf.mxu1 }
 0x192   : > { %v3117_v51 = vpop.permute.xlu1 %879  ;;  %v3119_v36 = vpop.permute.xlu0 %874  ;;  %v1355_v62 = vadd.f32 %v1354_v33, %v2654_v30  ;;  %v1430_v35 = vadd.f32 %v1429_v39, %v2866_v3 }
 0x194   : > { %1393 = vmatmul.bf16.gmra.mxu0 %v2148_v41  ;;  %1468 = vmatmul.bf16.gmra.mxu1 %v2163_v17  ;;  %v1585_v17 = vmax.f32 %v1355_v62, 0.0 }
 0x195   : > { %1528 = vmatmul.bf16.gmra.mxu2 %v2175_v40  ;;  %v3121_v12 = vpop.permute.xlu2 %1019  ;;  %v1615_v40 = vmax.f32 %v1430_v35, 0.0 }
 0x196   : > { %3442 = vst [vmem:[#allocation47_spill] sm:$0xff] %v3121_v12 }
 0x198   : > { %v3125_v18 = vpop.f32.mrf.mxu2  ;;  %v1549_v24 = vpop.f32.mrf.mxu3 }
 0x199   : > { %3443 = vst [vmem:[#allocation48_spill] sm:$0xff] %v3125_v18  ;;  %v1356_v21 = vpop.f32.mrf.mxu0  ;;  %v1431_v53 = vpop.f32.mrf.mxu1 }
 0x19a   : > { %v1357_v15 = vadd.f32 %v1356_v21, %v2696_v48  ;;  %v1432_v27 = vadd.f32 %v1431_v53, %v2906_v28  ;;  %v3129_v38 = vpop.permute.xlu1 %1014  ;;  %v3131_v41 = vpop.permute.xlu0 %939  ;;  %v2149_v48 = vld [vmem:[%s3393_s1 + $0x60] sm:$0xff] }
 0x19b   : > { %3444 = vst [vmem:[#allocation49_spill] sm:$0xff] %v3129_v38 }
 0x19c   : > { %3445 = vst [vmem:[#allocation50_spill] sm:$0xff] %v3131_v41  ;;  %v1586_v12 = vmax.f32 %v1357_v15, 0.0  ;;  %v1616_v19 = vmax.f32 %v1432_v27, 0.0 }
 0x19d   : > { %v3133_v30 = vpop.permute.xlu2 %1004 }
 0x19e   : > { %3446 = vst [vmem:[#allocation51_spill] sm:$0xff] %v3133_v30  ;;  %v3135_v3 = vpack.c.bf16 %v1586_v12, %v1585_v17  ;;  %v3137_v33 = vpack.c.bf16 %v1616_v19, %v1615_v40 }
 0x1a0   : > { %3447 = vst [vmem:[#allocation52_spill] sm:$0xff] %v3137_v33  ;;  %v3139_v39 = vpop.f32.mrf.mxu2  ;;  %v1551_v7 = vpop.f32.mrf.mxu3 }
 0x1a1   : > { %v3144_v28 = vpop.f32.mrf.mxu0  ;;  %v1434_v53 = vpop.f32.mrf.mxu1 }
 0x1a2   : > { %v3146_v21 = vpop.permute.xlu1 %929  ;;  %v3148_v15 = vpop.permute.xlu0 %924  ;;  %v1435_v19 = vadd.f32 %v1434_v53, %v2904_v26  ;;  %v2150_v53 = vld [vmem:[%s3393_s1 + $0x68] sm:$0xff] }
 0x1a3   : > { %3448 = vst [vmem:[#allocation53_spill] sm:$0xff] %v3146_v21 }
 0x1a4   : > { %3449 = vst [vmem:[#allocation54_spill] sm:$0xff] %v3148_v15  ;;  %1398 = vmatmul.bf16.gmra.mxu0 %v2149_v48  ;;  %v1617_v21 = vmax.f32 %v1435_v19, 0.0 }
 0x1a5   : > { %v3150_v27 = vpop.permute.xlu2 %919 }
 0x1a6   : > { %3450 = vst [vmem:[#allocation55_spill] sm:$0xff] %v3150_v27 }
 0x1a8   : > { %v3153_v12 = vpop.f32.mrf.mxu2  ;;  %v1554_v62 = vpop.f32.mrf.mxu3 }
 0x1a9   : > { %v3155_v35 = vpop.f32.mrf.mxu0  ;;  %v1436_v17 = vpop.f32.mrf.mxu1 }
 0x1aa   : > { %v1437_v40 = vadd.f32 %v1436_v17, %v2893_v22  ;;  %v3158_v41 = vpop.permute.xlu1 %914  ;;  %v3160_v30 = vpop.permute.xlu0 %1009 }
 0x1ab   : > { %3451 = vst [vmem:[#allocation56_spill] sm:$0xff] %v3160_v30 }
 0x1ac   : > { %v1618_v38 = vmax.f32 %v1437_v40, 0.0 }
 0x1ad   : > { %v3162_v15 = vpop.permute.xlu2 %904 }
 0x1ae   : > { %v3164_v48 = vpack.c.bf16 %v1618_v38, %v1617_v21 }
 0x1b0   : > { %3452 = vst [vmem:[#allocation57_spill] sm:$0xff] %v3164_v48  ;;  %v3166_v27 = vpop.f32.mrf.mxu2  ;;  %v1556_v26 = vpop.f32.mrf.mxu3 }
 0x1b1   : > { %v3171_v60 = vpop.f32.mrf.mxu0  ;;  %v3173_v22 = vpop.f32.mrf.mxu1 }
 0x1b2   : > { %v1000_v17 = vpop.permute.xlu1 %999  ;;  %v995_v32 = vpop.permute.xlu0 %994 }
 0x1b3   : > { %v1557_v30 = vadd.f32 %v1556_v26, %v1000_v17  ;;  %v1555_v19 = vadd.f32 %v1554_v62, %v995_v32 }
 0x1b4   : > { %1403 = vmatmul.bf16.gmra.mxu0 %v2150_v53 }
 0x1b5   : > { %v1666_v40 = vmax.f32 %v1557_v30, 0.0  ;;  %v1665_v33 = vmax.f32 %v1555_v19, 0.0  ;;  %v990_v38 = vpop.permute.xlu2 %989 }
 0x1b6   : > { %v1552_v48 = vadd.f32 %v1551_v7, %v990_v38 }
 0x1b7   : > { %v3175_v21 = vpack.c.bf16 %v1666_v40, %v1665_v33  ;;  %v2151_v33 = vld [vmem:[%s3393_s1 + $0x70] sm:$0xff] }
 0x1b8   : > { %v1499_v6 = vpop.f32.mrf.mxu2  ;;  %v3177_v61 = vpop.f32.mrf.mxu3  ;;  %v1664_v16 = vmax.f32 %v1552_v48, 0.0 }
 0x1b9   : > { %3453 = vst [vmem:[#allocation58_spill] sm:$0xff] %v3175_v21  ;;  %v1366_v37 = vpop.f32.mrf.mxu0  ;;  %v3179_v54 = vpop.f32.mrf.mxu1 }
 0x1ba   : > { %3454 = vst [vmem:[#allocation59_spill] sm:$0xff] %v3177_v61  ;;  %v985_v25 = vpop.permute.xlu1 %984  ;;  %v910_v55 = vpop.permute.xlu0 %909 }
 0x1bb   : > { %v1550_v9 = vadd.f32 %v1549_v24, %v985_v25 }
 0x1bd   : > { %v1663_v44 = vmax.f32 %v1550_v9, 0.0  ;;  %v975_v26 = vpop.permute.xlu2 %974 }
 0x1bf   : > { %v3181_v32 = vpack.c.bf16 %v1664_v16, %v1663_v44  ;;  %v1545_v16 = vadd.f32 %v3090_v45, %v975_v26 }
 0x1c0   : > { %v1501_v30 = vpop.f32.mrf.mxu2  ;;  %v3188_v40 = vpop.f32.mrf.mxu3 }
 0x1c1   : > { %3455 = vst [vmem:[#allocation60_spill] sm:$0xff] %v3181_v32  ;;  %v1369_v62 = vpop.f32.mrf.mxu0  ;;  %v3186_v53 = vpop.f32.mrf.mxu1  ;;  %v1661_v20 = vmax.f32 %v1545_v16, 0.0 }
 0x1c2   : > { %v900_v17 = vpop.permute.xlu1 %899  ;;  %v895_v19 = vpop.permute.xlu0 %894  ;;  %3456 = vst [vmem:[#allocation61_spill] sm:$0xff] %v3188_v40 }
 0x1c4   : > { %1408 = vmatmul.bf16.gmra.mxu0 %v2151_v33 }
 0x1c5   : > { %v890_v7 = vpop.permute.xlu2 %889 }
 0x1c6   : > { %v1502_v48 = vadd.f32 %v1501_v30, %v890_v7 }
 0x1c8   : > { %v1504_v25 = vpop.f32.mrf.mxu2  ;;  %v1644_v18 = vmax.f32 %v1502_v48, 0.0  ;;  %v3194_v40 = vpop.f32.mrf.mxu3 }
 0x1c9   : > { %v1371_v9 = vpop.f32.mrf.mxu0  ;;  %v3190_v24 = vpop.f32.mrf.mxu1  ;;  %v1505_v44 = vadd.f32 %v1504_v25, %v895_v19 }
 0x1ca   : > { %v885_v38 = vpop.permute.xlu1 %884  ;;  %v980_v32 = vpop.permute.xlu0 %979 }
 0x1cb   : > { %v1500_v21 = vadd.f32 %v1499_v6, %v885_v38  ;;  %v1547_v61 = vadd.f32 %v3106_v52, %v980_v32  ;;  %v1645_v30 = vmax.f32 %v1505_v44, 0.0  ;;  %v1367_v44 = vadd.f32 %v1366_v37, %v2721_v57 }
 0x1cc   : > { %v1360_v37 = vadd.f32 %v3144_v28, %v2694_v47 }
 0x1cd   : > { %v1643_v10 = vmax.f32 %v1500_v21, 0.0  ;;  %v1662_v8 = vmax.f32 %v1547_v61, 0.0 }
 0x1cf   : > { %v3196_v33 = vpack.c.bf16 %v1662_v8, %v1661_v20  ;;  %v3198_v23 = vpack.c.bf16 %v1644_v18, %v1643_v10  ;;  %v1372_v8 = vadd.f32 %v1371_v9, %v2738_v1  ;;  %v1590_v1 = vmax.f32 %v1367_v44, 0.0 }
 0x1d0   : > { %v1506_v42 = vpop.f32.mrf.mxu2  ;;  %v3202_v6 = vpop.f32.mrf.mxu3 }
 0x1d1   : > { %v1507_v19 = vadd.f32 %v1506_v42, %v900_v17  ;;  %v1374_v25 = vpop.f32.mrf.mxu0  ;;  %v1449_v45 = vpop.f32.mrf.mxu1  ;;  %v1370_v42 = vadd.f32 %v1369_v62, %v2698_v49  ;;  %v1592_v16 = vmax.f32 %v1372_v8, 0.0 }
 0x1d2   : > { %v1375_v52 = vadd.f32 %v1374_v25, %v2736_v63  ;;  %v1365_v63 = vadd.f32 %v3171_v60, %v2723_v58 }
 0x1d3   : > { %v1646_v26 = vmax.f32 %v1507_v19, 0.0  ;;  %v1591_v38 = vmax.f32 %v1370_v42, 0.0 }
 0x1d4   : > { %v1593_v18 = vmax.f32 %v1375_v52, 0.0  ;;  %v1587_v52 = vmax.f32 %v1360_v37, 0.0 }
 0x1d5   : > { %v3200_v7 = vpack.c.bf16 %v1646_v26, %v1645_v30  ;;  %v1684_v62 = vpack.c.bf16 %v1592_v16, %v1591_v38  ;;  %v1589_v30 = vmax.f32 %v1365_v63, 0.0 }
 0x1d8   : > { %v1509_v61 = vpop.f32.mrf.mxu2  ;;  %v3214_v49 = vpop.f32.mrf.mxu3 }
 0x1d9   : > { %v1510_v21 = vadd.f32 %v1509_v61, %v3162_v15  ;;  %v1376_v32 = vpop.f32.mrf.mxu0  ;;  %v1451_v20 = vpop.f32.mrf.mxu1 }
 0x1da   : > { %v1377_v10 = vadd.f32 %v1376_v32, %v2725_v59  ;;  %v1362_v59 = vadd.f32 %v3155_v35, %v2683_v43  ;;  %v1452_v47 = vadd.f32 %v1451_v20, %v2941_v56  ;;  %v1442_v20 = vadd.f32 %v3179_v54, %v2931_v46 }
 0x1db   : > { %v1647_v9 = vmax.f32 %v1510_v21, 0.0  ;;  %v1495_v54 = vadd.f32 %v3153_v12, %v3119_v36 }
 0x1dc   : > { %v1594_v17 = vmax.f32 %v1377_v10, 0.0  ;;  %v1588_v60 = vmax.f32 %v1362_v59, 0.0  ;;  %v1620_v46 = vmax.f32 %v1442_v20, 0.0  ;;  %v3459_v59 = vld [vmem:[#allocation48_spill] sm:$0xff]  ;;  %v3471_v20 = vld [vmem:[#allocation31_spill] sm:$0xff] }
 0x1de   : > { %v1685_v48 = vpack.c.bf16 %v1594_v17, %v1593_v18  ;;  %v1682_v42 = vpack.c.bf16 %v1588_v60, %v1587_v52  ;;  %v1450_v18 = vadd.f32 %v1449_v45, %v2946_v4  ;;  %v3463_v60 = vld [vmem:[#allocation27_spill] sm:$0xff] }
 0x1e0   : > { %v1511_v19 = vpop.f32.mrf.mxu2  ;;  %1753 = vmatpush.bf16.msrb.mxu1 %v1685_v48  ;;  %v3229_v17 = vpop.f32.mrf.mxu3  ;;  %v1624_v48 = vmax.f32 %v1452_v47, 0.0 }
 0x1e1   : > { %v1512_v15 = vadd.f32 %v1511_v19, %v910_v55  ;;  %v1379_v25 = vpop.f32.mrf.mxu0  ;;  %v1454_v26 = vpop.f32.mrf.mxu1  ;;  %v1683_v55 = vpack.c.bf16 %v1590_v1, %v1589_v30 }
 0x1e2   : > { %v1380_v61 = vadd.f32 %v1379_v25, %v2765_v13  ;;  %v1455_v43 = vadd.f32 %v1454_v26, %v2975_v0  ;;  %v3457_v25 = vld [vmem:[#allocation34_spill] sm:$0xff]  ;;  %v3458_v26 = vld [vmem:[#allocation24_spill] sm:$0xff] }
 0x1e3   : > { %v1648_v57 = vmax.f32 %v1512_v15, 0.0  ;;  %v1490_v1 = vadd.f32 %v3459_v59, %v3458_v26  ;;  %v3477_v59 = vld [vmem:[#allocation6_spill] sm:$0xff] }
 0x1e4   : > { %1754 = vmatpush.bf16.msrb.mxu1 %v1684_v62  ;;  %v1595_v13 = vmax.f32 %v1380_v61, 0.0  ;;  %v1625_v0 = vmax.f32 %v1455_v43, 0.0  ;;  %v1641_v62 = vmax.f32 %v1495_v54, 0.0  ;;  %v3473_v54 = vld [vmem:[#allocation52_spill] sm:$0xff] }
 0x1e5   : > { %v3218_v58 = vpack.c.bf16 %v1648_v57, %v1647_v9  ;;  %v3460_v9 = vld [vmem:[#allocation28_spill] sm:$0xff]  ;;  %v3461_v57 = vld [vmem:[#allocation41_spill] sm:$0xff]  ;;  %v1639_v47 = vmax.f32 %v1490_v1, 0.0 }
 0x1e6   : > { %v1485_v37 = vadd.f32 %v3461_v57, %v3460_v9 }
 0x1e8   : > { %v1514_v35 = vpop.f32.mrf.mxu2  ;;  %1755 = vmatpush.bf16.msrb.mxu1 %v1683_v55  ;;  %v3464_v55 = vld [vmem:[#allocation46_spill] sm:$0xff] }
 0x1e9   : > { %v3223_v32 = vadd.f32 %v1514_v35, %v3158_v41  ;;  %v1381_v21 = vpop.f32.mrf.mxu0  ;;  %v1456_v8 = vpop.f32.mrf.mxu1  ;;  %v1447_v41 = vadd.f32 %v3190_v24, %v2948_v5  ;;  %v1497_v5 = vadd.f32 %v3166_v27, %v3117_v51  ;;  %v1440_v24 = vadd.f32 %v3173_v22, %v2933_v50 }
 0x1ea   : > { %v1382_v28 = vadd.f32 %v1381_v21, %v2763_v11  ;;  %v1457_v10 = vadd.f32 %v1456_v8, %v2973_v29  ;;  %v1445_v11 = vadd.f32 %v3186_v53, %v2914_v34  ;;  %v1623_v29 = vmax.f32 %v1450_v18, 0.0  ;;  %v3250_v34 = vld [vmem:[%s3395_s3] sm:$0xff]  ;;  %v3465_v8 = vld [vmem:[#allocation25_spill] sm:$0xff] }
 0x1eb   : > { %v1622_v38 = vmax.f32 %v1447_v41, 0.0  ;;  %v1492_v51 = vadd.f32 %v3139_v39, %v3059_v31  ;;  %v1642_v27 = vmax.f32 %v1497_v5, 0.0  ;;  %v1735_v50 = vunpack.c.l.b16 %v3250_v34  ;;  %v3462_v31 = vld [vmem:[#allocation7_spill] sm:$0xff]  ;;  %v3468_v41 = vld [vmem:[#allocation57_spill] sm:$0xff] }
 0x1ec   : > { %v1596_v44 = vmax.f32 %v1382_v28, 0.0  ;;  %v1626_v16 = vmax.f32 %v1457_v10, 0.0  ;;  %1756 = vmatpush.bf16.msrb.mxu1 %v1682_v42  ;;  %v1700_v19 = vpack.c.bf16 %v1624_v48, %v1623_v29  ;;  %v1621_v15 = vmax.f32 %v1445_v11, 0.0  ;;  %v3466_v10 = vld [vmem:[#allocation23_spill] sm:$0xff]  ;;  %v3467_v42 = vld [vmem:[#allocation36_spill] sm:$0xff] }
 0x1ed   : > { %v1619_v22 = vmax.f32 %v1440_v24, 0.0  ;;  %v1487_v52 = vadd.f32 %v3464_v55, %v3463_v60  ;;  %v1709_v61 = vpack.c.bf16 %v1642_v27, %v1641_v62  ;;  %v1741_v43 = vpack.c.b16 %v1735_v50, %v1735_v50  ;;  %v3469_v11 = vld [vmem:[#allocation16_spill] sm:$0xff]  ;;  %v3472_v24 = vld [vmem:[#allocation38_spill] sm:$0xff]  ;;  %v3478_v62 = vld [vmem:[#allocation45_spill] sm:$0xff] }
 0x1ee   : > { %v1701_v63 = vpack.c.bf16 %v1626_v16, %v1625_v0  ;;  %v3233_v56 = vpack.c.bf16 %v1596_v44, %v1595_v13  ;;  %v1699_v53 = vpack.c.bf16 %v1622_v38, %v1621_v15  ;;  %v1482_v18 = vadd.f32 %v3467_v42, %v3466_v10  ;;  %v3470_v29 = vld [vmem:[#allocation32_spill] sm:$0xff]  ;;  %v3481_v60 = vld [vmem:[#allocation47_spill] sm:$0xff]  ;;  %v3485_v10 = vld [vmem:[#allocation61_spill] sm:$0xff] }
 0x1ef   : > { %v1698_v30 = vpack.c.bf16 %v1620_v46, %v1619_v22  ;;  %v1637_v13 = vmax.f32 %v1485_v37, 0.0  ;;  %v1638_v0 = vmax.f32 %v1487_v52, 0.0  ;;  %v1635_v38 = vmax.f32 %v3471_v20, 0.0  ;;  %v3474_v46 = vld [vmem:[#allocation39_spill] sm:$0xff]  ;;  %v3476_v22 = vld [vmem:[#allocation40_spill] sm:$0xff]  ;;  %v3488_v20 = vld [vmem:[#allocation22_spill] sm:$0xff] }
 0x1f0   : > { %1757 = vmatpush.bf16.msrb.mxu1 %v3135_v3  ;;  %1779 = vmatpush.bf16.msrb.mxu3 %v1701_v63  ;;  %v1574_v3 = vpop.f32.mrf.mxu3  ;;  %v1567_v55 = vadd.f32 %v3202_v6, %v3481_v60  ;;  %v3486_v6 = vld [vmem:[#allocation51_spill] sm:$0xff] }
 0x1f1   : > { %v1384_v4 = vpop.f32.mrf.mxu0  ;;  %v3238_v45 = vpop.f32.mrf.mxu1  ;;  %v1707_v5 = vpack.c.bf16 %v1638_v0, %v1637_v13  ;;  %v3487_v0 = vld [vmem:[#allocation59_spill] sm:$0xff] }
 0x1f4   : > { %1758 = vmatpush.bf16.msrb.mxu1 %v3100_v14  ;;  %1780 = vmatpush.bf16.msrb.mxu3 %v1700_v19  ;;  %v1385_v14 = vadd.f32 %v1384_v4, %v2740_v2  ;;  %v1640_v2 = vmax.f32 %v1492_v51, 0.0  ;;  %v1422_v4 = vadd.f32 %v3470_v29, %v3469_v11  ;;  %v1636_v19 = vmax.f32 %v1482_v18, 0.0  ;;  %v3475_v51 = vld [vmem:[#allocation26_spill] sm:$0xff] }
 0x1f5   : > { %v1611_v27 = vmax.f32 %v3475_v51, 0.0  ;;  %v1670_v18 = vmax.f32 %v1567_v55, 0.0  ;;  %v965_v51 = vpop.permute.xlu0 %964 }
 0x1f6   : > { %v1597_v35 = vmax.f32 %v1385_v14, 0.0  ;;  %v1708_v44 = vpack.c.bf16 %v1640_v2, %v1639_v47  ;;  %v1612_v50 = vmax.f32 %v1422_v4, 0.0  ;;  %v1572_v14 = vadd.f32 %v3229_v17, %v3476_v22  ;;  %v3484_v47 = vld [vmem:[#allocation56_spill] sm:$0xff] }
 0x1f7   : > { %v1706_v26 = vpack.c.bf16 %v1636_v19, %v1635_v38  ;;  %v1562_v42 = vadd.f32 %v3485_v10, %v3484_v47 }
 0x1f8   : > { %1759 = vmatpush.bf16.msrb.mxu1 %v3457_v25  ;;  %1781 = vmatpush.bf16.msrb.mxu3 %v1699_v53  ;;  %v1576_v16 = vpop.f32.mrf.mxu3  ;;  %v1575_v53 = vadd.f32 %v1574_v3, %v3474_v46  ;;  %v3480_v3 = vld [vmem:[#allocation5_spill] sm:$0xff]  ;;  %v1672_v17 = vmax.f32 %v1572_v14, 0.0 }
 0x1f9   : > { %v1386_v36 = vpop.f32.mrf.mxu0  ;;  %v3261_v12 = vpop.f32.mrf.mxu1  ;;  %v1577_v15 = vadd.f32 %v1576_v16, %v3472_v24  ;;  %v3489_v24 = vld [vmem:[#allocation18_spill] sm:$0xff] }
 0x1fa   : > { %v1387_v39 = vadd.f32 %v1386_v36, %v3462_v31  ;;  %v3479_v36 = vld [vmem:[#allocation42_spill] sm:$0xff]  ;;  %v1673_v57 = vmax.f32 %v1575_v53, 0.0  ;;  %v970_v53 = vpop.permute.xlu1 %969 }
 0x1fb   : > { %v1674_v25 = vmax.f32 %v1577_v15, 0.0  ;;  %v1570_v9 = vadd.f32 %v3214_v49, %v3479_v36  ;;  %v3483_v49 = vld [vmem:[#allocation29_spill] sm:$0xff] }
 0x1fc   : > { %v1598_v21 = vmax.f32 %v1387_v39, 0.0  ;;  %1760 = vmatpush.bf16.msrb.mxu1 %v3465_v8  ;;  %1782 = vmatpush.bf16.msrb.mxu3 %v1698_v30  ;;  %v1694_v30 = vpack.c.bf16 %v1612_v50, %v1611_v27  ;;  %v3491_v27 = vld [vmem:[#allocation19_spill] sm:$0xff]  ;;  %v3494_v36 = vld [vmem:[#allocation37_spill] sm:$0xff] }
 0x1fd   : > { %v1725_v52 = vpack.c.bf16 %v1674_v25, %v1673_v57  ;;  %v3492_v25 = vld [vmem:[#allocation58_spill] sm:$0xff] }
 0x1fe   : > { %v3269_v28 = vpack.c.bf16 %v1598_v21, %v1597_v35  ;;  %v1671_v21 = vmax.f32 %v1570_v9, 0.0  ;;  %v1542_v9 = vadd.f32 %v3494_v36, %v970_v53  ;;  %v3495_v57 = vld [vmem:[#allocation30_spill] sm:$0xff] }
 0x1ff   : > { %1761 = vmatmul.bf16.vlgmr.msrb.gmra.mxu1 %v1741_v43  ;;  %v3482_v43 = vld [vmem:[#allocation49_spill] sm:$0xff] }
 0x200   : > { %1792 = vmatpush.bf16.msra.mxu1 %v1709_v61  ;;  %1783 = vmatpush.bf16.msrb.mxu3 %v3468_v41  ;;  %v1565_v35 = vadd.f32 %v3194_v40, %v3482_v43  ;;  %v1724_v13 = vpack.c.bf16 %v1672_v17, %v1671_v21  ;;  %v1668_v40 = vmax.f32 %v1562_v42, 0.0  ;;  %v1660_v17 = vmax.f32 %v1542_v9, 0.0 }
 0x201   : > { %v1389_v48 = vpop.f32.mrf.mxu0  ;;  %v1464_v63 = vpop.f32.mrf.mxu1 }
 0x202   : > { %v1390_v1 = vadd.f32 %v1389_v48, %v3477_v59  ;;  %v1669_v16 = vmax.f32 %v1565_v35, 0.0  ;;  %v1465_v50 = vadd.f32 %v1464_v63, %v3491_v27  ;;  %v3497_v63 = vld [vmem:[#allocation60_spill] sm:$0xff] }
 0x203   : > { %v3503_v27 = vld [vmem:[#allocation8_spill] sm:$0xff] }
 0x204   : > { %1793 = vmatpush.bf16.msra.mxu1 %v1708_v44  ;;  %1784 = vmatpush.bf16.msrb.mxu3 %v3473_v54  ;;  %v1599_v2 = vmax.f32 %v1390_v1, 0.0  ;;  %v1560_v44 = vadd.f32 %v3487_v0, %v3486_v6  ;;  %v1723_v11 = vpack.c.bf16 %v1670_v18, %v1669_v16  ;;  %v3490_v54 = vld [vmem:[#allocation21_spill] sm:$0xff]  ;;  %v3498_v18 = vld [vmem:[#allocation15_spill] sm:$0xff]  ;;  %v3500_v16 = vld [vmem:[#allocation14_spill] sm:$0xff] }
 0x205   : > { %v3499_v0 = vld [vmem:[#allocation11_spill] sm:$0xff] }
 0x206   : > { %v1667_v29 = vmax.f32 %v1560_v44, 0.0 }
 0x208   : > { %1794 = vmatpush.bf16.msra.mxu1 %v1707_v5  ;;  %1785 = vmatpush.bf16.msrb.mxu3 %v3478_v62  ;;  %v1722_v4 = vpack.c.bf16 %v1668_v40, %v1667_v29  ;;  %v3501_v40 = vld [vmem:[#allocation12_spill] sm:$0xff] }
 0x209   : > { %v1391_v37 = vpop.f32.mrf.mxu0  ;;  %v1466_v31 = vpop.f32.mrf.mxu1 }
 0x20a   : > { %v1392_v39 = vadd.f32 %v1391_v37, %v3480_v3  ;;  %v1467_v15 = vadd.f32 %v1466_v31, %v3489_v24  ;;  %v1540_v37 = vadd.f32 %v3495_v57, %v965_v51  ;;  %v3496_v31 = vld [vmem:[#allocation17_spill] sm:$0xff] }
 0x20b   : > { %v1460_v3 = vadd.f32 %v3238_v45, %v3496_v31  ;;  %v3502_v24 = vld [vmem:[#allocation13_spill] sm:$0xff] }
 0x20c   : > { %1795 = vmatpush.bf16.msra.mxu1 %v1706_v26  ;;  %v1600_v61 = vmax.f32 %v1392_v39, 0.0  ;;  %1786 = vmatpush.bf16.msrb.mxu3 %v1694_v30  ;;  %v3493_v26 = vld [vmem:[#allocation20_spill] sm:$0xff]  ;;  %v1630_v1 = vmax.f32 %v1467_v15, 0.0  ;;  %v1629_v39 = vmax.f32 %v1465_v50, 0.0 }
 0x20d   : > { %v1462_v59 = vadd.f32 %v3261_v12, %v3493_v26  ;;  %v1627_v12 = vmax.f32 %v1460_v3, 0.0 }
 0x20e   : > { %v3293_v8 = vpack.c.bf16 %v1600_v61, %v1599_v2  ;;  %v1703_v55 = vpack.c.bf16 %v1630_v1, %v1629_v39  ;;  %v3313_v2 = vpop.f32.mrf.mxu2  ;;  %v3505_v1 = vld [vmem:[#allocation10_spill] sm:$0xff]  ;;  %v1677_v39 = vld [vmem:[%s3395_s3 + $0x10] sm:$0xff] }
 0x20f   : > { %v1628_v60 = vmax.f32 %v1462_v59, 0.0 }
 0x210   : > { %1796 = vmatpush.bf16.msra.mxu1 %v3483_v49  ;;  %1818 = vmatpush.bf16.msra.mxu3 %v1725_v52  ;;  %v1659_v52 = vmax.f32 %v1540_v37, 0.0 }
 0x211   : > { %v3299_v41 = vpop.f32.mrf.mxu0  ;;  %v1469_v48 = vpop.f32.mrf.mxu1  ;;  %v1702_v61 = vpack.c.bf16 %v1628_v60, %v1627_v12  ;;  %v3506_v60 = vld [vmem:[#allocation43_spill] sm:$0xff]  ;;  %v3508_v12 = vld [vmem:[#allocation50_spill] sm:$0xff] }
 0x212   : > { %v1470_v38 = vadd.f32 %v1469_v48, %v3488_v20  ;;  %v1718_v43 = vpack.c.bf16 %v1660_v17, %v1659_v52  ;;  %v3507_v17 = vld [vmem:[#allocation33_spill] sm:$0xff] }
 0x214   : > { %1819 = vmatpush.bf16.msra.mxu3 %v1724_v13  ;;  %v1631_v22 = vmax.f32 %v1470_v38, 0.0 }
 0x216   : > { %v1519_v45 = vpop.f32.mrf.mxu2 }
 0x218   : > { %1820 = vmatpush.bf16.msra.mxu3 %v1723_v11  ;;  %v1676_v11 = vld [vmem:[%s3395_s3 + $0x8] sm:$0xff] }
 0x219   : > { %v1396_v19 = vpop.f32.mrf.mxu0  ;;  %v1471_v5 = vpop.f32.mrf.mxu1  ;;  %v1737_v38 = vunpack.c.l.b16 %v1676_v11 }
 0x21a   : > { %v1472_v46 = vadd.f32 %v1471_v5, %v3490_v54  ;;  %v1738_v5 = vunpack.c.h.b16 %v1676_v11 }
 0x21b   : > { %v1743_v53 = vpack.c.b16 %v1737_v38, %v1737_v38 }
 0x21c   : > { %1821 = vmatpush.bf16.msra.mxu3 %v1722_v4  ;;  %v1632_v14 = vmax.f32 %v1472_v46, 0.0  ;;  %v1744_v51 = vpack.c.b16 %v1738_v5, %v1738_v5 }
 0x21d   : > { %1787 = vmatmul.bf16.vlgmr.msrb.gmra.mxu3 %v1743_v53 }
 0x21e   : > { %v1704_v62 = vpack.c.bf16 %v1632_v14, %v1631_v22  ;;  %v1521_v49 = vpop.f32.mrf.mxu2  ;;  %v3504_v14 = vld [vmem:[#allocation9_spill] sm:$0xff] }
 0x220   : > { %1822 = vmatpush.bf16.msra.mxu3 %v3492_v25  ;;  %1797 = vmatpush.bf16.msra.mxu1 %v1704_v62  ;;  %v1397_v25 = vadd.f32 %v1396_v19, %v3504_v14  ;;  %v1395_v62 = vadd.f32 %v3299_v41, %v3505_v1 }
 0x221   : > { %v1399_v30 = vpop.f32.mrf.mxu0 }
 0x222   : > { %v1400_v50 = vadd.f32 %v1399_v30, %v3503_v27  ;;  %v1602_v57 = vmax.f32 %v1397_v25, 0.0  ;;  %v1601_v31 = vmax.f32 %v1395_v62, 0.0  ;;  %v1740_v30 = vunpack.c.h.b16 %v1677_v39 }
 0x224   : > { %1823 = vmatpush.bf16.msra.mxu3 %v3497_v63  ;;  %1798 = vmatpush.bf16.msra.mxu1 %v1703_v55  ;;  %v1603_v36 = vmax.f32 %v1400_v50, 0.0  ;;  %v1689_v3 = vpack.c.bf16 %v1602_v57, %v1601_v31  ;;  %v1746_v63 = vpack.c.b16 %v1740_v30, %v1740_v30  ;;  %v1736_v55 = vunpack.c.h.b16 %v3250_v34 }
 0x226   : > { %v1524_v42 = vpop.f32.mrf.mxu2 }
 0x228   : > { %1824 = vmatpush.bf16.msra.mxu3 %v3196_v33  ;;  %1799 = vmatpush.bf16.msra.mxu1 %v1702_v61 }
 0x229   : > { %v1401_v35 = vpop.f32.mrf.mxu0 }
 0x22a   : > { %v1402_v15 = vadd.f32 %v1401_v35, %v3502_v24  ;;  %v1742_v35 = vpack.c.b16 %v1736_v55, %v1736_v55 }
 0x22b   : > { %1800 = vmatmul.bf16.vlgmr.msra.gmra.mxu1 %v1744_v51 }
 0x22c   : > { %1825 = vmatpush.bf16.msra.mxu3 %v1718_v43  ;;  %v1604_v26 = vmax.f32 %v1402_v15, 0.0 }
 0x22e   : > { %v1526_v29 = vpop.f32.mrf.mxu2  ;;  %v1690_v37 = vpack.c.bf16 %v1604_v26, %v1603_v36 }
 0x22f   : > { %1826 = vmatmul.bf16.vlgmr.msra.gmra.mxu3 %v1746_v63  ;;  %v1527_v61 = vadd.f32 %v1526_v29, %v3508_v12  ;;  %v1649_v29 = vmax.f32 %v3223_v32, 0.0 }
 0x231   : > { %v1404_v21 = vpop.f32.mrf.mxu0 }
 0x232   : > { %v1405_v33 = vadd.f32 %v1404_v21, %v3501_v40  ;;  %v3509_v21 = vld [vmem:[#allocation44_spill] sm:$0xff] }
 0x234   : > { %v1605_v22 = vmax.f32 %v1405_v33, 0.0 }
 0x236   : > { %v1529_v9 = vpop.f32.mrf.mxu2 }
 0x237   : > { %v1530_v52 = vadd.f32 %v1529_v9, %v3507_v17 }
 0x239   : > { %v1406_v47 = vpop.f32.mrf.mxu0 }
 0x23a   : > { %v1407_v44 = vadd.f32 %v1406_v47, %v3499_v0  ;;  %v1525_v47 = vadd.f32 %v1524_v42, %v3509_v21  ;;  %v3512_v0 = vld [vmem:[#allocation54_spill] sm:$0xff] }
 0x23c   : > { %v1606_v54 = vmax.f32 %v1407_v44, 0.0  ;;  %v1653_v44 = vmax.f32 %v1525_v47, 0.0 }
 0x23e   : > { %v1691_v59 = vpack.c.bf16 %v1606_v54, %v1605_v22  ;;  %v1531_v19 = vpop.f32.mrf.mxu2 }
 0x23f   : > { %v1532_v41 = vadd.f32 %v1531_v19, %v3506_v60 }
 0x241   : > { %v1409_v10 = vpop.f32.mrf.mxu0  ;;  %v1656_v43 = vmax.f32 %v1532_v41, 0.0 }
 0x242   : > { %v1410_v13 = vadd.f32 %v1409_v10, %v3498_v18  ;;  %v1655_v10 = vmax.f32 %v1530_v52, 0.0  ;;  %v3511_v18 = vld [vmem:[#allocation53_spill] sm:$0xff] }
 0x244   : > { %v1607_v4 = vmax.f32 %v1410_v13, 0.0  ;;  %v1522_v13 = vadd.f32 %v1521_v49, %v3511_v18  ;;  %v1716_v34 = vpack.c.bf16 %v1656_v43, %v1655_v10 }
 0x246   : > { %v1652_v40 = vmax.f32 %v1522_v13, 0.0 }
 0x249   : > { %v1411_v6 = vpop.f32.mrf.mxu0 }
 0x24a   : > { %v1412_v48 = vadd.f32 %v1411_v6, %v3500_v16  ;;  %v1654_v6 = vmax.f32 %v1527_v61, 0.0  ;;  %v3513_v16 = vld [vmem:[#allocation55_spill] sm:$0xff] }
 0x24c   : > { %v1608_v20 = vmax.f32 %v1412_v48, 0.0  ;;  %v1517_v48 = vadd.f32 %v3313_v2, %v3513_v16  ;;  %v1715_v33 = vpack.c.bf16 %v1654_v6, %v1653_v44 }
 0x24e   : > { %v1692_v46 = vpack.c.bf16 %v1608_v20, %v1607_v4  ;;  %v1650_v42 = vmax.f32 %v1517_v48, 0.0 }
 0x250   : > { %1767 = vmatpush.bf16.msrb.mxu2 %v1692_v46  ;;  %v1713_v49 = vpack.c.bf16 %v1650_v42, %v1649_v29 }
 0x254   : > { %1768 = vmatpush.bf16.msrb.mxu2 %v1691_v59 }
 0x258   : > { %1769 = vmatpush.bf16.msrb.mxu2 %v1690_v37 }
 0x25c   : > { %1770 = vmatpush.bf16.msrb.mxu2 %v1689_v3 }
 0x260   : > { %1771 = vmatpush.bf16.msrb.mxu2 %v3293_v8  ;;  %v3510_v8 = vld [vmem:[#allocation35_spill] sm:$0xff] }
 0x264   : > { %1772 = vmatpush.bf16.msrb.mxu2 %v3269_v28  ;;  %v1520_v28 = vadd.f32 %v1519_v45, %v3512_v0  ;;  %v1739_v45 = vunpack.c.l.b16 %v1677_v39 }
 0x266   : > { %v1745_v20 = vpack.c.b16 %v1739_v45, %v1739_v45 }
 0x268   : > { %1773 = vmatpush.bf16.msrb.mxu2 %v3233_v56  ;;  %v1651_v56 = vmax.f32 %v1520_v28, 0.0 }
 0x26a   : > { %v1714_v11 = vpack.c.bf16 %v1652_v40, %v1651_v56 }
 0x26b   : > { %1774 = vmatmul.bf16.vlgmr.msrb.gmra.mxu2 %v1742_v35 }
 0x26c   : > { %1805 = vmatpush.bf16.msra.mxu2 %v3510_v8 }
 0x270   : > { %1806 = vmatpush.bf16.msra.mxu2 %v1716_v34 }
 0x274   : > { %1807 = vmatpush.bf16.msra.mxu2 %v1715_v33 }
 0x278   : > { %1808 = vmatpush.bf16.msra.mxu2 %v1714_v11 }
 0x27c   : > { %1809 = vmatpush.bf16.msra.mxu2 %v1713_v49  ;;  %v1762_v4 = vpop.f32.mrf.mxu1 }
 0x280   : > { %1810 = vmatpush.bf16.msra.mxu2 %v3218_v58  ;;  %v1730_v58 = vpop.permute.xlu2 %1729 }
 0x281   : > { %v1763_v51 = vadd.f32 %v1762_v4, %v1730_v58 }
 0x284   : > { %1811 = vmatpush.bf16.msra.mxu2 %v3200_v7  ;;  %v1764_v2 = vpop.f32.mrf.mxu1 }
 0x288   : > { %1812 = vmatpush.bf16.msra.mxu2 %v3198_v23 }
 0x28b   : > { %1813 = vmatmul.bf16.vlgmr.msra.gmra.mxu2 %v1745_v20 }
 0x2a0   : > { %v1788_v5 = vpop.f32.mrf.mxu3 }
 0x2a8   : > { %v1801_v38 = vpop.f32.mrf.mxu1  ;;  %v1790_v24 = vpop.f32.mrf.mxu3 }
 0x2b0   : > { %v1803_v32 = vpop.f32.mrf.mxu1 }
 0x2b2   : > { %v1827_v15 = vpop.f32.mrf.mxu3 }
 0x2ba   : > { %v1829_v46 = vpop.f32.mrf.mxu3 }
 0x2ee   : > { %v1775_v54 = vpop.f32.mrf.mxu2 }
 0x2ef   : > { %v1776_v27 = vadd.f32 %v1775_v54, %v1763_v51 }
 0x2f1   : > { %v1789_v7 = vadd.f32 %v1788_v5, %v1776_v27 }
 0x2f3   : > { %v1802_v23 = vadd.f32 %v1801_v38, %v1789_v7 }
 0x2f6   : > { %v1777_v53 = vpop.f32.mrf.mxu2 }
 0x30e   : > { %v1814_v50 = vpop.f32.mrf.mxu2 }
 0x30f   : > { %v1815_v22 = vadd.f32 %v1814_v50, %v1802_v23 }
 0x311   : > { %v1828_v14 = vadd.f32 %v1827_v15, %v1815_v22 }
 0x313   : > { %1831 = vst [vmem:[%s241_s8] sm:$0xff] %v1828_v14 }
 0x314   : > { %2304 = shalt.err (!%p2301_p7)
}
 0x315   : > { %2194 = dma.vmem_to_hbm [thread:$0]  (%p2463_p3), %s1848_s9, 128, %s1850_s10, %s1833_s22  }
 0x316   : > { %v1816_v25 = vpop.f32.mrf.mxu2 }
 0x317 PF: > { %p2200_p9 = scmp.ge.s32.totalorder %s2371_s25, 2  ;;  %s1861_s14 = sand.u32 1, %s2343_s18  }
 0x318   : > { %s1862_s27 = scalar_lea.sflag [#allocation3], %s1861_s14 }
 0x319   : > { %p2197_p10 = pnand %p2200_p9, %p2472_p8 }
 0x31b   : > { %p2198_p11 = pneg %p2197_p10 }
 0x31d   : > { %2338 = dma.done.wait (%p2198_p11), %s1862_s27, 128  }
 0x31e   : > { %2340 = vsyncadd (%p2198_p11), %s1862_s27, 4294967168  ;;  %s18_s25 = sadd.s32 1, %s2371_s25   ;;  %s3514_s18 = smov %s2347_s19 }
 0x31f   : > { %p15_p12 = scmp.ge.s32.totalorder %s18_s25, 6   ;;  %s3515_s19 = smov %s2351_s20 }
 0x320   : > { %s3516_s20 = smov %s2481_s11  ;;  %s3517_s21 = smov %s2363_s23 }
 0x321   : > { %s3518_s22 = smov %s2367_s24  ;;  %s3519_s23 = smov %s3522_s28 }
 0x322   : > { %s3520_s24 = smov %s3526_s29  ;;  %17 = sbr.rel (!%p15_p12) target bundleno = 5 (0x5), region = 81 }
 0x327   :  { %1868 = vsyncpa [#allocation3], 1 }
 0x328   :  { %1870 = vsyncpa [#allocation3 + $0x1], 1 }

</bundles_post_ra>
